<compile_context>
chip_gen: v5e
topology: v5e:2x2
jax: 0.10.0
libtpu: 0.0.40
codegen_flags: <defaults>
</compile_context>

<pallas_src>
import functools

import jax
import jax.numpy as jnp
from jax import lax
from jax.experimental import pallas as pl
from jax.experimental.pallas import tpu as pltpu

BN_EPS = 1e-3


# ----------------------------------------------------------------------------
# Fused kernel
# ----------------------------------------------------------------------------
def _inception_res_a_kernel(x_ref, mask_ref, w0_ref, b0_ref,
                            w3_ref, b3_ref,
                            w5b_ref, b5b_ref,
                            w5c_ref, b5c_ref,
                            wf_ref,
                            o_ref, *, H, W, c1, c3r, c5r):
    N = x_ref.shape[1]                                       # images_per_step * H*W
    x = x_ref[...].astype(jnp.float32)                       # (Cin, N)
    masks = mask_ref[...]                                     # (9, N) 0/1 f32

    def conv3x3_relu(h, w_ref_, b_ref_):
        """3x3 'same' conv + bias + ReLU as ONE (Co, 9*Ci) x (9*Ci, N) matmul."""
        taps = []
        t = 0
        for dy in (-1, 0, 1):
            for dx in (-1, 0, 1):
                d = dy * W + dx
                if d == 0:
                    taps.append(h)                            # center tap: mask == 1
                else:
                    # shifted[:, i] == h[:, i + d]; wrap / cross-image reads are
                    # exactly the positions the precomputed mask zeroes out.
                    shifted = pltpu.roll(h, shift=(-d) % N, axis=1)
                    taps.append(shifted * masks[t:t + 1, :])
                t += 1
        tap_stack = jnp.concatenate(taps, axis=0)             # (9*Ci, N)
        acc = jnp.dot(w_ref_[...], tap_stack,
                      preferred_element_type=jnp.float32)
        return jnp.maximum(acc + b_ref_[...], 0.0)

    # ---- Stage 1: the three branch-entry 1x1 convs batched in one matmul.
    h0 = jnp.dot(w0_ref[...], x, preferred_element_type=jnp.float32)
    h0 = jnp.maximum(h0 + b0_ref[...], 0.0)                   # (c1+c3r+c5r, N)
    x1 = h0[:c1]
    r3 = h0[c1:c1 + c3r]
    r5 = h0[c1 + c3r:c1 + c3r + c5r]

    # ---- Branch 3: one 3x3 conv.   Branch 5: two stacked 3x3 convs.
    x3 = conv3x3_relu(r3, w3_ref, b3_ref)
    x5 = conv3x3_relu(conv3x3_relu(r5, w5b_ref, b5b_ref), w5c_ref, b5c_ref)

    # ---- Final 1x1 conv (scale pre-folded into wf) + residual add + ReLU.
    cat = jnp.concatenate([x1, x3, x5], axis=0)               # (c1+c3+c5_2, N)
    y = jnp.dot(wf_ref[...], cat, preferred_element_type=jnp.float32)
    o_ref[...] = jnp.maximum(y + x, 0.0).astype(o_ref.dtype)


# ----------------------------------------------------------------------------
# Wrapper: fold BN into weights, build stacked/fused weights, single pallas_call
# ----------------------------------------------------------------------------
def _fold_bn(p):
    # TODO(synk): eval-mode (running-stats) BatchNorm only; training-mode
    # batch-statistics BN is not implemented.
    s = p["gamma"] * lax.rsqrt(p["var"] + BN_EPS)
    return s, p["beta"] - p["mean"] * s


def _fold_1x1(p):
    s, b = _fold_bn(p)
    return p["w"] * s[:, None], b[:, None]                    # (Co,Ci), (Co,1)


def _fold_3x3(p):
    """BN-folded 3x3 weight, laid out (Co, Kh*Kw*Ci) to match tap stacking."""
    s, b = _fold_bn(p)
    w = p["w"] * s[:, None, None, None]                       # OIHW (Co,Ci,3,3)
    w = jnp.transpose(w, (0, 2, 3, 1))                        # (Co,3,3,Ci)
    return w.reshape(w.shape[0], -1), b[:, None]              # (Co,9*Ci), (Co,1)


def _build_masks(H, W, images_per_step):
    """(9, images_per_step*H*W) 0/1 f32 boundary masks, one row per 3x3 tap."""
    pos = jnp.arange(H * W)
    y, x = pos // W, pos % W
    rows = []
    for dy in (-1, 0, 1):
        for dx in (-1, 0, 1):
            rows.append((y + dy >= 0) & (y + dy < H) & (x + dx >= 0) & (x + dx < W))
    mask = jnp.stack(rows).astype(jnp.float32)                # (9, HW)
    return jnp.tile(mask, (1, images_per_step))               # (9, G*HW)


def _full_spec(arr):
    n = arr.ndim
    return pl.BlockSpec(arr.shape, lambda g: (0,) * n)


def inception_res_a_forward(params, x_nchw, scale):
    B, cin, H, W = x_nchw.shape
    HW = H * W

    # Batched first-stage 1x1 weights (all three branches share the input).
    w1, bias1 = _fold_1x1(params["b1"])
    w3a, bias3a = _fold_1x1(params["b3a"])
    w5a, bias5a = _fold_1x1(params["b5a"])
    w0 = jnp.concatenate([w1, w3a, w5a], axis=0)
    b0 = jnp.concatenate([bias1, bias3a, bias5a], axis=0)
    c1, c3r, c5r = w1.shape[0], w3a.shape[0], w5a.shape[0]

    w3, b3 = _fold_3x3(params["b3b"])
    w5b, b5b = _fold_3x3(params["b5b"])
    w5c, b5c = _fold_3x3(params["b5c"])

    # Final 1x1 conv: keep it whole (single matmul) and fold `scale` into it.
    wf = params["wf"] * jnp.float32(scale)                    # (Cf, c1+c3+c5_2)
    cf = wf.shape[0]
    assert cf == cin, "residual add requires conv1_f == in_dim"

    # Fold batch into the lane axis; split into 2 image-aligned lane-tiles
    # (parallel grid -> both v7x TensorCores) only when each tile keeps >= 512
    # lanes so the per-step pipeline overhead stays amortized.
    if B % 2 == 0 and (B // 2) * HW >= 512:
        num_steps = 2
    else:
        num_steps = 1
    G = B // num_steps                                        # images per grid step
    N = G * HW                                                # lane width per step

    mask = _build_masks(H, W, G)                              # (9, N)

    # (B, Cin, H, W) -> channel-major (Cin, B*HW); pixels (and batch) on lanes.
    x_cm = jnp.transpose(x_nchw.reshape(B, cin, HW), (1, 0, 2)).reshape(cin, B * HW)

    kernel = functools.partial(_inception_res_a_kernel, H=H, W=W,
                               c1=c1, c3r=c3r, c5r=c5r)
    out_cm = pl.pallas_call(
        kernel,
        out_shape=jax.ShapeDtypeStruct((cf, B * HW), x_nchw.dtype),
        grid=(num_steps,),
        in_specs=[
            pl.BlockSpec((cin, N), lambda g: (0, g)),
            _full_spec(mask),
            _full_spec(w0), _full_spec(b0),
            _full_spec(w3), _full_spec(b3),
            _full_spec(w5b), _full_spec(b5b),
            _full_spec(w5c), _full_spec(b5c),
            _full_spec(wf),
        ],
        out_specs=pl.BlockSpec((cf, N), lambda g: (0, g)),
        compiler_params=pltpu.CompilerParams(
            dimension_semantics=("parallel",)),
    )(x_cm, mask, w0, b0, w3, b3, w5b, b5b, w5c, b5c, wf)

    return jnp.transpose(out_cm.reshape(cf, B, HW), (1, 0, 2)).reshape(B, cf, H, W)


# ----------------------------------------------------------------------------
# Parameter init (deterministic, synthetic, PyTorch-like layouts)
# ----------------------------------------------------------------------------
def _init_basic_conv(key, cin, cout, k):
    kw, kg, kb, km, kv = jax.random.split(key, 5)
    if k == 1:
        w = jax.random.normal(kw, (cout, cin), jnp.float32) * 0.1
    else:
        w = jax.random.normal(kw, (cout, cin, k, k), jnp.float32) * 0.1   # OIHW
    gamma = jax.random.uniform(kg, (cout,), jnp.float32, 0.5, 1.5)
    beta = jax.random.normal(kb, (cout,), jnp.float32) * 0.1
    mean = jax.random.normal(km, (cout,), jnp.float32) * 0.1
    var = jax.random.uniform(kv, (cout,), jnp.float32, 0.5, 1.5)
    return dict(w=w, gamma=gamma, beta=beta, mean=mean, var=var)


def init_params(key, in_dim, conv1, conv3_r, conv3, conv5_r, conv5_1, conv5_2,
                conv1_f):
    keys = jax.random.split(key, 7)
    return dict(
        b1=_init_basic_conv(keys[0], in_dim, conv1, 1),
        b3a=_init_basic_conv(keys[1], in_dim, conv3_r, 1),
        b3b=_init_basic_conv(keys[2], conv3_r, conv3, 3),
        b5a=_init_basic_conv(keys[3], in_dim, conv5_r, 1),
        b5b=_init_basic_conv(keys[4], conv5_r, conv5_1, 3),
        b5c=_init_basic_conv(keys[5], conv5_1, conv5_2, 3),
        wf=jax.random.normal(keys[6], (conv1_f, conv1 + conv3 + conv5_2),
                             jnp.float32) * 0.1,
    )


# ----------------------------------------------------------------------------
# Pure-JAX reference (NCHW, unfolded BN) for correctness checking
# ----------------------------------------------------------------------------
def _ref_conv(x, w_oihw, pad):
    return lax.conv_general_dilated(
        x, w_oihw, (1, 1), [(pad, pad), (pad, pad)],
        dimension_numbers=("NCHW", "OIHW", "NCHW"))


def _ref_basic(x, p, k):
    w = p["w"] if k == 3 else p["w"][:, :, None, None]
    y = _ref_conv(x, w, 1 if k == 3 else 0)
    inv = lax.rsqrt(p["var"] + BN_EPS)
    y = ((y - p["mean"][None, :, None, None]) * inv[None, :, None, None]
         * p["gamma"][None, :, None, None] + p["beta"][None, :, None, None])
    return jnp.maximum(y, 0.0)


def reference_forward(params, x_nchw, scale):
    x_1 = _ref_basic(x_nchw, params["b1"], 1)
    x_3 = _ref_basic(_ref_basic(x_nchw, params["b3a"], 1), params["b3b"], 3)
    x_5 = _ref_basic(
        _ref_basic(_ref_basic(x_nchw, params["b5a"], 1), params["b5b"], 3),
        params["b5c"], 3)
    x_cat = jnp.concatenate([x_1, x_3, x_5], axis=1)
    y = _ref_conv(x_cat, params["wf"][:, :, None, None], 0)
    return jnp.maximum(y * scale + x_nchw, 0.0)


# ----------------------------------------------------------------------------
if __name__ == "__main__":
    # in_dim must equal conv1_f for the residual add (module contract).
    B, in_dim, H, W = 2, 16, 16, 16
    conv1, conv3_r, conv3, conv5_r, conv5_1, conv5_2, conv1_f = 8, 8, 8, 8, 8, 16, 16
    scale = 0.2

    key = jax.random.PRNGKey(0)
    kx, kp = jax.random.split(key)
    x_nchw = jax.random.normal(kx, (B, in_dim, H, W), jnp.float32)
    params = init_params(kp, in_dim, conv1, conv3_r, conv3, conv5_r, conv5_1,
                         conv5_2, conv1_f)

    fwd = jax.jit(functools.partial(inception_res_a_forward, scale=scale))
    out = jax.block_until_ready(fwd(params, x_nchw))
    ref = jax.block_until_ready(reference_forward(params, x_nchw, scale))

    assert out.shape == (B, conv1_f, H, W)
    max_err = jnp.max(jnp.abs(out - ref))
    assert jnp.allclose(out, ref, atol=1e-3, rtol=1e-3), (
        f"max abs err = {max_err}")
    print("KERNEL_OK")
</pallas_src>

<mosaic_0001>
module attributes {stable_mosaic.version = 11 : i64} {
  func.func @_inception_res_a_kernel(%arg0: i32, %arg1: memref<16x512xf32, #tpu.memory_space<vmem>>, %arg2: memref<9x512xf32, #tpu.memory_space<vmem>>, %arg3: memref<24x16xf32, #tpu.memory_space<vmem>>, %arg4: memref<24x1xf32, #tpu.memory_space<vmem>>, %arg5: memref<8x72xf32, #tpu.memory_space<vmem>>, %arg6: memref<8x1xf32, #tpu.memory_space<vmem>>, %arg7: memref<8x72xf32, #tpu.memory_space<vmem>>, %arg8: memref<8x1xf32, #tpu.memory_space<vmem>>, %arg9: memref<16x72xf32, #tpu.memory_space<vmem>>, %arg10: memref<16x1xf32, #tpu.memory_space<vmem>>, %arg11: memref<16x32xf32, #tpu.memory_space<vmem>>, %arg12: memref<16x512xf32, #tpu.memory_space<vmem>>) attributes {dimension_semantics = [#tpu.dimension_semantics<parallel>], iteration_bounds = array<i64: 1>, scalar_prefetch = 0 : i64, scratch_operands = 0 : i64, tpu.core_type = #tpu.core_type<tc>, window_params = [{transform_indices = @transform_0, window_bounds = array<i64: 16, 512>}, {pipeline_mode = #tpu.pipeline_mode<synchronous>, transform_indices = @transform_1, window_bounds = array<i64: 9, 512>}, {pipeline_mode = #tpu.pipeline_mode<synchronous>, transform_indices = @transform_2, window_bounds = array<i64: 24, 16>}, {pipeline_mode = #tpu.pipeline_mode<synchronous>, transform_indices = @transform_3, window_bounds = array<i64: 24, 1>}, {pipeline_mode = #tpu.pipeline_mode<synchronous>, transform_indices = @transform_4, window_bounds = array<i64: 8, 72>}, {pipeline_mode = #tpu.pipeline_mode<synchronous>, transform_indices = @transform_5, window_bounds = array<i64: 8, 1>}, {pipeline_mode = #tpu.pipeline_mode<synchronous>, transform_indices = @transform_6, window_bounds = array<i64: 8, 72>}, {pipeline_mode = #tpu.pipeline_mode<synchronous>, transform_indices = @transform_7, window_bounds = array<i64: 8, 1>}, {pipeline_mode = #tpu.pipeline_mode<synchronous>, transform_indices = @transform_8, window_bounds = array<i64: 16, 72>}, {pipeline_mode = #tpu.pipeline_mode<synchronous>, transform_indices = @transform_9, window_bounds = array<i64: 16, 1>}, {pipeline_mode = #tpu.pipeline_mode<synchronous>, transform_indices = @transform_10, window_bounds = array<i64: 16, 32>}, {transform_indices = @transform_11, window_bounds = array<i64: 16, 512>}]} {
    %c0 = arith.constant 0 : index
    %c0_0 = arith.constant 0 : index
    %0 = vector.load %arg1[%c0, %c0_0] : memref<16x512xf32, #tpu.memory_space<vmem>>, vector<16x512xf32>
    %c0_1 = arith.constant 0 : index
    %c0_2 = arith.constant 0 : index
    %1 = vector.load %arg2[%c0_1, %c0_2] : memref<9x512xf32, #tpu.memory_space<vmem>>, vector<9x512xf32>
    %c0_3 = arith.constant 0 : index
    %c0_4 = arith.constant 0 : index
    %2 = vector.load %arg3[%c0_3, %c0_4] : memref<24x16xf32, #tpu.memory_space<vmem>>, vector<24x16xf32>
    %cst = arith.constant dense<0.000000e+00> : vector<24x512xf32>
    %3 = tpu.matmul %2, %0, %cst {dimension_numbers = #tpu.dot_dimension_numbers<[1], [0], [0], [1], [0, 0, 1, 1], [], []>} : vector<24x16xf32>, vector<16x512xf32>, vector<24x512xf32> -> vector<24x512xf32>
    %c0_5 = arith.constant 0 : index
    %c0_6 = arith.constant 0 : index
    %4 = vector.load %arg4[%c0_5, %c0_6] : memref<24x1xf32, #tpu.memory_space<vmem>>, vector<24x1xf32>
    %5 = vector.broadcast %4 : vector<24x1xf32> to vector<24x512xf32>
    %6 = arith.addf %3, %5 : vector<24x512xf32>
    %cst_7 = arith.constant 0.000000e+00 : f32
    %7 = vector.broadcast %cst_7 : f32 to vector<24x512xf32>
    %8 = arith.maximumf %6, %7 : vector<24x512xf32>
    %9 = vector.extract_strided_slice %8 {offsets = [0, 0], sizes = [8, 512], strides = [1, 1]} : vector<24x512xf32> to vector<8x512xf32>
    %10 = vector.extract_strided_slice %8 {offsets = [8, 0], sizes = [8, 512], strides = [1, 1]} : vector<24x512xf32> to vector<8x512xf32>
    %11 = vector.extract_strided_slice %8 {offsets = [16, 0], sizes = [8, 512], strides = [1, 1]} : vector<24x512xf32> to vector<8x512xf32>
    %c17_i32 = arith.constant 17 : i32
    %12 = tpu.dynamic_rotate %10 by %c17_i32 dim 1 : vector<8x512xf32>, i32 -> vector<8x512xf32>
    %13 = vector.extract_strided_slice %1 {offsets = [0, 0], sizes = [1, 512], strides = [1, 1]} : vector<9x512xf32> to vector<1x512xf32>
    %14 = vector.broadcast %13 : vector<1x512xf32> to vector<8x512xf32>
    %15 = arith.mulf %12, %14 : vector<8x512xf32>
    %c16_i32 = arith.constant 16 : i32
    %16 = tpu.dynamic_rotate %10 by %c16_i32 dim 1 : vector<8x512xf32>, i32 -> vector<8x512xf32>
    %17 = vector.extract_strided_slice %1 {offsets = [1, 0], sizes = [1, 512], strides = [1, 1]} : vector<9x512xf32> to vector<1x512xf32>
    %18 = vector.broadcast %17 : vector<1x512xf32> to vector<8x512xf32>
    %19 = arith.mulf %16, %18 : vector<8x512xf32>
    %c15_i32 = arith.constant 15 : i32
    %20 = tpu.dynamic_rotate %10 by %c15_i32 dim 1 : vector<8x512xf32>, i32 -> vector<8x512xf32>
    %21 = vector.extract_strided_slice %1 {offsets = [2, 0], sizes = [1, 512], strides = [1, 1]} : vector<9x512xf32> to vector<1x512xf32>
    %22 = vector.broadcast %21 : vector<1x512xf32> to vector<8x512xf32>
    %23 = arith.mulf %20, %22 : vector<8x512xf32>
    %c1_i32 = arith.constant 1 : i32
    %24 = tpu.dynamic_rotate %10 by %c1_i32 dim 1 : vector<8x512xf32>, i32 -> vector<8x512xf32>
    %25 = vector.extract_strided_slice %1 {offsets = [3, 0], sizes = [1, 512], strides = [1, 1]} : vector<9x512xf32> to vector<1x512xf32>
    %26 = vector.broadcast %25 : vector<1x512xf32> to vector<8x512xf32>
    %27 = arith.mulf %24, %26 : vector<8x512xf32>
    %c511_i32 = arith.constant 511 : i32
    %28 = tpu.dynamic_rotate %10 by %c511_i32 dim 1 : vector<8x512xf32>, i32 -> vector<8x512xf32>
    %29 = vector.extract_strided_slice %1 {offsets = [5, 0], sizes = [1, 512], strides = [1, 1]} : vector<9x512xf32> to vector<1x512xf32>
    %30 = vector.broadcast %29 : vector<1x512xf32> to vector<8x512xf32>
    %31 = arith.mulf %28, %30 : vector<8x512xf32>
    %c497_i32 = arith.constant 497 : i32
    %32 = tpu.dynamic_rotate %10 by %c497_i32 dim 1 : vector<8x512xf32>, i32 -> vector<8x512xf32>
    %33 = vector.extract_strided_slice %1 {offsets = [6, 0], sizes = [1, 512], strides = [1, 1]} : vector<9x512xf32> to vector<1x512xf32>
    %34 = vector.broadcast %33 : vector<1x512xf32> to vector<8x512xf32>
    %35 = arith.mulf %32, %34 : vector<8x512xf32>
    %c496_i32 = arith.constant 496 : i32
    %36 = tpu.dynamic_rotate %10 by %c496_i32 dim 1 : vector<8x512xf32>, i32 -> vector<8x512xf32>
    %37 = vector.extract_strided_slice %1 {offsets = [7, 0], sizes = [1, 512], strides = [1, 1]} : vector<9x512xf32> to vector<1x512xf32>
    %38 = vector.broadcast %37 : vector<1x512xf32> to vector<8x512xf32>
    %39 = arith.mulf %36, %38 : vector<8x512xf32>
    %c495_i32 = arith.constant 495 : i32
    %40 = tpu.dynamic_rotate %10 by %c495_i32 dim 1 : vector<8x512xf32>, i32 -> vector<8x512xf32>
    %41 = vector.extract_strided_slice %1 {offsets = [8, 0], sizes = [1, 512], strides = [1, 1]} : vector<9x512xf32> to vector<1x512xf32>
    %42 = vector.broadcast %41 : vector<1x512xf32> to vector<8x512xf32>
    %43 = arith.mulf %40, %42 : vector<8x512xf32>
    %44 = tpu.concatenate %15, %19, %23, %27, %10, %31, %35, %39, %43 in 0 : vector<8x512xf32>, vector<8x512xf32>, vector<8x512xf32>, vector<8x512xf32>, vector<8x512xf32>, vector<8x512xf32>, vector<8x512xf32>, vector<8x512xf32>, vector<8x512xf32> -> vector<72x512xf32>
    %c0_8 = arith.constant 0 : index
    %c0_9 = arith.constant 0 : index
    %45 = vector.load %arg5[%c0_8, %c0_9] : memref<8x72xf32, #tpu.memory_space<vmem>>, vector<8x72xf32>
    %cst_10 = arith.constant dense<0.000000e+00> : vector<8x512xf32>
    %46 = tpu.matmul %45, %44, %cst_10 {dimension_numbers = #tpu.dot_dimension_numbers<[1], [0], [0], [1], [0, 0, 1, 1], [], []>} : vector<8x72xf32>, vector<72x512xf32>, vector<8x512xf32> -> vector<8x512xf32>
    %c0_11 = arith.constant 0 : index
    %c0_12 = arith.constant 0 : index
    %47 = vector.load %arg6[%c0_11, %c0_12] : memref<8x1xf32, #tpu.memory_space<vmem>>, vector<8x1xf32>
    %48 = vector.broadcast %47 : vector<8x1xf32> to vector<8x512xf32>
    %49 = arith.addf %46, %48 : vector<8x512xf32>
    %cst_13 = arith.constant 0.000000e+00 : f32
    %50 = vector.broadcast %cst_13 : f32 to vector<8x512xf32>
    %51 = arith.maximumf %49, %50 : vector<8x512xf32>
    %c17_i32_14 = arith.constant 17 : i32
    %52 = tpu.dynamic_rotate %11 by %c17_i32_14 dim 1 : vector<8x512xf32>, i32 -> vector<8x512xf32>
    %53 = vector.extract_strided_slice %1 {offsets = [0, 0], sizes = [1, 512], strides = [1, 1]} : vector<9x512xf32> to vector<1x512xf32>
    %54 = vector.broadcast %53 : vector<1x512xf32> to vector<8x512xf32>
    %55 = arith.mulf %52, %54 : vector<8x512xf32>
    %c16_i32_15 = arith.constant 16 : i32
    %56 = tpu.dynamic_rotate %11 by %c16_i32_15 dim 1 : vector<8x512xf32>, i32 -> vector<8x512xf32>
    %57 = vector.extract_strided_slice %1 {offsets = [1, 0], sizes = [1, 512], strides = [1, 1]} : vector<9x512xf32> to vector<1x512xf32>
    %58 = vector.broadcast %57 : vector<1x512xf32> to vector<8x512xf32>
    %59 = arith.mulf %56, %58 : vector<8x512xf32>
    %c15_i32_16 = arith.constant 15 : i32
    %60 = tpu.dynamic_rotate %11 by %c15_i32_16 dim 1 : vector<8x512xf32>, i32 -> vector<8x512xf32>
    %61 = vector.extract_strided_slice %1 {offsets = [2, 0], sizes = [1, 512], strides = [1, 1]} : vector<9x512xf32> to vector<1x512xf32>
    %62 = vector.broadcast %61 : vector<1x512xf32> to vector<8x512xf32>
    %63 = arith.mulf %60, %62 : vector<8x512xf32>
    %c1_i32_17 = arith.constant 1 : i32
    %64 = tpu.dynamic_rotate %11 by %c1_i32_17 dim 1 : vector<8x512xf32>, i32 -> vector<8x512xf32>
    %65 = vector.extract_strided_slice %1 {offsets = [3, 0], sizes = [1, 512], strides = [1, 1]} : vector<9x512xf32> to vector<1x512xf32>
    %66 = vector.broadcast %65 : vector<1x512xf32> to vector<8x512xf32>
    %67 = arith.mulf %64, %66 : vector<8x512xf32>
    %c511_i32_18 = arith.constant 511 : i32
    %68 = tpu.dynamic_rotate %11 by %c511_i32_18 dim 1 : vector<8x512xf32>, i32 -> vector<8x512xf32>
    %69 = vector.extract_strided_slice %1 {offsets = [5, 0], sizes = [1, 512], strides = [1, 1]} : vector<9x512xf32> to vector<1x512xf32>
    %70 = vector.broadcast %69 : vector<1x512xf32> to vector<8x512xf32>
    %71 = arith.mulf %68, %70 : vector<8x512xf32>
    %c497_i32_19 = arith.constant 497 : i32
    %72 = tpu.dynamic_rotate %11 by %c497_i32_19 dim 1 : vector<8x512xf32>, i32 -> vector<8x512xf32>
    %73 = vector.extract_strided_slice %1 {offsets = [6, 0], sizes = [1, 512], strides = [1, 1]} : vector<9x512xf32> to vector<1x512xf32>
    %74 = vector.broadcast %73 : vector<1x512xf32> to vector<8x512xf32>
    %75 = arith.mulf %72, %74 : vector<8x512xf32>
    %c496_i32_20 = arith.constant 496 : i32
    %76 = tpu.dynamic_rotate %11 by %c496_i32_20 dim 1 : vector<8x512xf32>, i32 -> vector<8x512xf32>
    %77 = vector.extract_strided_slice %1 {offsets = [7, 0], sizes = [1, 512], strides = [1, 1]} : vector<9x512xf32> to vector<1x512xf32>
    %78 = vector.broadcast %77 : vector<1x512xf32> to vector<8x512xf32>
    %79 = arith.mulf %76, %78 : vector<8x512xf32>
    %c495_i32_21 = arith.constant 495 : i32
    %80 = tpu.dynamic_rotate %11 by %c495_i32_21 dim 1 : vector<8x512xf32>, i32 -> vector<8x512xf32>
    %81 = vector.extract_strided_slice %1 {offsets = [8, 0], sizes = [1, 512], strides = [1, 1]} : vector<9x512xf32> to vector<1x512xf32>
    %82 = vector.broadcast %81 : vector<1x512xf32> to vector<8x512xf32>
    %83 = arith.mulf %80, %82 : vector<8x512xf32>
    %84 = tpu.concatenate %55, %59, %63, %67, %11, %71, %75, %79, %83 in 0 : vector<8x512xf32>, vector<8x512xf32>, vector<8x512xf32>, vector<8x512xf32>, vector<8x512xf32>, vector<8x512xf32>, vector<8x512xf32>, vector<8x512xf32>, vector<8x512xf32> -> vector<72x512xf32>
    %c0_22 = arith.constant 0 : index
    %c0_23 = arith.constant 0 : index
    %85 = vector.load %arg7[%c0_22, %c0_23] : memref<8x72xf32, #tpu.memory_space<vmem>>, vector<8x72xf32>
    %cst_24 = arith.constant dense<0.000000e+00> : vector<8x512xf32>
    %86 = tpu.matmul %85, %84, %cst_24 {dimension_numbers = #tpu.dot_dimension_numbers<[1], [0], [0], [1], [0, 0, 1, 1], [], []>} : vector<8x72xf32>, vector<72x512xf32>, vector<8x512xf32> -> vector<8x512xf32>
    %c0_25 = arith.constant 0 : index
    %c0_26 = arith.constant 0 : index
    %87 = vector.load %arg8[%c0_25, %c0_26] : memref<8x1xf32, #tpu.memory_space<vmem>>, vector<8x1xf32>
    %88 = vector.broadcast %87 : vector<8x1xf32> to vector<8x512xf32>
    %89 = arith.addf %86, %88 : vector<8x512xf32>
    %cst_27 = arith.constant 0.000000e+00 : f32
    %90 = vector.broadcast %cst_27 : f32 to vector<8x512xf32>
    %91 = arith.maximumf %89, %90 : vector<8x512xf32>
    %c17_i32_28 = arith.constant 17 : i32
    %92 = tpu.dynamic_rotate %91 by %c17_i32_28 dim 1 : vector<8x512xf32>, i32 -> vector<8x512xf32>
    %93 = vector.extract_strided_slice %1 {offsets = [0, 0], sizes = [1, 512], strides = [1, 1]} : vector<9x512xf32> to vector<1x512xf32>
    %94 = vector.broadcast %93 : vector<1x512xf32> to vector<8x512xf32>
    %95 = arith.mulf %92, %94 : vector<8x512xf32>
    %c16_i32_29 = arith.constant 16 : i32
    %96 = tpu.dynamic_rotate %91 by %c16_i32_29 dim 1 : vector<8x512xf32>, i32 -> vector<8x512xf32>
    %97 = vector.extract_strided_slice %1 {offsets = [1, 0], sizes = [1, 512], strides = [1, 1]} : vector<9x512xf32> to vector<1x512xf32>
    %98 = vector.broadcast %97 : vector<1x512xf32> to vector<8x512xf32>
    %99 = arith.mulf %96, %98 : vector<8x512xf32>
    %c15_i32_30 = arith.constant 15 : i32
    %100 = tpu.dynamic_rotate %91 by %c15_i32_30 dim 1 : vector<8x512xf32>, i32 -> vector<8x512xf32>
    %101 = vector.extract_strided_slice %1 {offsets = [2, 0], sizes = [1, 512], strides = [1, 1]} : vector<9x512xf32> to vector<1x512xf32>
    %102 = vector.broadcast %101 : vector<1x512xf32> to vector<8x512xf32>
    %103 = arith.mulf %100, %102 : vector<8x512xf32>
    %c1_i32_31 = arith.constant 1 : i32
    %104 = tpu.dynamic_rotate %91 by %c1_i32_31 dim 1 : vector<8x512xf32>, i32 -> vector<8x512xf32>
    %105 = vector.extract_strided_slice %1 {offsets = [3, 0], sizes = [1, 512], strides = [1, 1]} : vector<9x512xf32> to vector<1x512xf32>
    %106 = vector.broadcast %105 : vector<1x512xf32> to vector<8x512xf32>
    %107 = arith.mulf %104, %106 : vector<8x512xf32>
    %c511_i32_32 = arith.constant 511 : i32
    %108 = tpu.dynamic_rotate %91 by %c511_i32_32 dim 1 : vector<8x512xf32>, i32 -> vector<8x512xf32>
    %109 = vector.extract_strided_slice %1 {offsets = [5, 0], sizes = [1, 512], strides = [1, 1]} : vector<9x512xf32> to vector<1x512xf32>
    %110 = vector.broadcast %109 : vector<1x512xf32> to vector<8x512xf32>
    %111 = arith.mulf %108, %110 : vector<8x512xf32>
    %c497_i32_33 = arith.constant 497 : i32
    %112 = tpu.dynamic_rotate %91 by %c497_i32_33 dim 1 : vector<8x512xf32>, i32 -> vector<8x512xf32>
    %113 = vector.extract_strided_slice %1 {offsets = [6, 0], sizes = [1, 512], strides = [1, 1]} : vector<9x512xf32> to vector<1x512xf32>
    %114 = vector.broadcast %113 : vector<1x512xf32> to vector<8x512xf32>
    %115 = arith.mulf %112, %114 : vector<8x512xf32>
    %c496_i32_34 = arith.constant 496 : i32
    %116 = tpu.dynamic_rotate %91 by %c496_i32_34 dim 1 : vector<8x512xf32>, i32 -> vector<8x512xf32>
    %117 = vector.extract_strided_slice %1 {offsets = [7, 0], sizes = [1, 512], strides = [1, 1]} : vector<9x512xf32> to vector<1x512xf32>
    %118 = vector.broadcast %117 : vector<1x512xf32> to vector<8x512xf32>
    %119 = arith.mulf %116, %118 : vector<8x512xf32>
    %c495_i32_35 = arith.constant 495 : i32
    %120 = tpu.dynamic_rotate %91 by %c495_i32_35 dim 1 : vector<8x512xf32>, i32 -> vector<8x512xf32>
    %121 = vector.extract_strided_slice %1 {offsets = [8, 0], sizes = [1, 512], strides = [1, 1]} : vector<9x512xf32> to vector<1x512xf32>
    %122 = vector.broadcast %121 : vector<1x512xf32> to vector<8x512xf32>
    %123 = arith.mulf %120, %122 : vector<8x512xf32>
    %124 = tpu.concatenate %95, %99, %103, %107, %91, %111, %115, %119, %123 in 0 : vector<8x512xf32>, vector<8x512xf32>, vector<8x512xf32>, vector<8x512xf32>, vector<8x512xf32>, vector<8x512xf32>, vector<8x512xf32>, vector<8x512xf32>, vector<8x512xf32> -> vector<72x512xf32>
    %c0_36 = arith.constant 0 : index
    %c0_37 = arith.constant 0 : index
    %125 = vector.load %arg9[%c0_36, %c0_37] : memref<16x72xf32, #tpu.memory_space<vmem>>, vector<16x72xf32>
    %cst_38 = arith.constant dense<0.000000e+00> : vector<16x512xf32>
    %126 = tpu.matmul %125, %124, %cst_38 {dimension_numbers = #tpu.dot_dimension_numbers<[1], [0], [0], [1], [0, 0, 1, 1], [], []>} : vector<16x72xf32>, vector<72x512xf32>, vector<16x512xf32> -> vector<16x512xf32>
    %c0_39 = arith.constant 0 : index
    %c0_40 = arith.constant 0 : index
    %127 = vector.load %arg10[%c0_39, %c0_40] : memref<16x1xf32, #tpu.memory_space<vmem>>, vector<16x1xf32>
    %128 = vector.broadcast %127 : vector<16x1xf32> to vector<16x512xf32>
    %129 = arith.addf %126, %128 : vector<16x512xf32>
    %cst_41 = arith.constant 0.000000e+00 : f32
    %130 = vector.broadcast %cst_41 : f32 to vector<16x512xf32>
    %131 = arith.maximumf %129, %130 : vector<16x512xf32>
    %132 = tpu.concatenate %9, %51, %131 in 0 : vector<8x512xf32>, vector<8x512xf32>, vector<16x512xf32> -> vector<32x512xf32>
    %c0_42 = arith.constant 0 : index
    %c0_43 = arith.constant 0 : index
    %133 = vector.load %arg11[%c0_42, %c0_43] : memref<16x32xf32, #tpu.memory_space<vmem>>, vector<16x32xf32>
    %cst_44 = arith.constant dense<0.000000e+00> : vector<16x512xf32>
    %134 = tpu.matmul %133, %132, %cst_44 {dimension_numbers = #tpu.dot_dimension_numbers<[1], [0], [0], [1], [0, 0, 1, 1], [], []>} : vector<16x32xf32>, vector<32x512xf32>, vector<16x512xf32> -> vector<16x512xf32>
    %135 = arith.addf %134, %0 : vector<16x512xf32>
    %cst_45 = arith.constant 0.000000e+00 : f32
    %136 = vector.broadcast %cst_45 : f32 to vector<16x512xf32>
    %137 = arith.maximumf %135, %136 : vector<16x512xf32>
    %c0_46 = arith.constant 0 : index
    %c0_47 = arith.constant 0 : index
    %138 = vector.load %arg12[%c0_46, %c0_47] : memref<16x512xf32, #tpu.memory_space<vmem>>, vector<16x512xf32>
    tpu.vector_store %arg12[%c0_46, %c0_47], %137 {strides = array<i32>} : memref<16x512xf32, #tpu.memory_space<vmem>>, vector<16x512xf32>,
    return
  }
  func.func @transform_0(%arg0: i32) -> (i32, i32) {
    %c0_i32 = arith.constant 0 : i32
    %c0_i32_0 = arith.constant 0 : i32
    return %c0_i32, %arg0 : i32, i32
  }
  func.func @transform_1(%arg0: i32) -> (i32, i32) {
    %c0_i32 = arith.constant 0 : i32
    %c0_i32_0 = arith.constant 0 : i32
    %c0_i32_1 = arith.constant 0 : i32
    return %c0_i32, %c0_i32_0 : i32, i32
  }
  func.func @transform_2(%arg0: i32) -> (i32, i32) {
    %c0_i32 = arith.constant 0 : i32
    %c0_i32_0 = arith.constant 0 : i32
    %c0_i32_1 = arith.constant 0 : i32
    return %c0_i32, %c0_i32_0 : i32, i32
  }
  func.func @transform_3(%arg0: i32) -> (i32, i32) {
    %c0_i32 = arith.constant 0 : i32
    %c0_i32_0 = arith.constant 0 : i32
    %c0_i32_1 = arith.constant 0 : i32
    return %c0_i32, %c0_i32_0 : i32, i32
  }
  func.func @transform_4(%arg0: i32) -> (i32, i32) {
    %c0_i32 = arith.constant 0 : i32
    %c0_i32_0 = arith.constant 0 : i32
    %c0_i32_1 = arith.constant 0 : i32
    return %c0_i32, %c0_i32_0 : i32, i32
  }
  func.func @transform_5(%arg0: i32) -> (i32, i32) {
    %c0_i32 = arith.constant 0 : i32
    %c0_i32_0 = arith.constant 0 : i32
    %c0_i32_1 = arith.constant 0 : i32
    return %c0_i32, %c0_i32_0 : i32, i32
  }
  func.func @transform_6(%arg0: i32) -> (i32, i32) {
    %c0_i32 = arith.constant 0 : i32
    %c0_i32_0 = arith.constant 0 : i32
    %c0_i32_1 = arith.constant 0 : i32
    return %c0_i32, %c0_i32_0 : i32, i32
  }
  func.func @transform_7(%arg0: i32) -> (i32, i32) {
    %c0_i32 = arith.constant 0 : i32
    %c0_i32_0 = arith.constant 0 : i32
    %c0_i32_1 = arith.constant 0 : i32
    return %c0_i32, %c0_i32_0 : i32, i32
  }
  func.func @transform_8(%arg0: i32) -> (i32, i32) {
    %c0_i32 = arith.constant 0 : i32
    %c0_i32_0 = arith.constant 0 : i32
    %c0_i32_1 = arith.constant 0 : i32
    return %c0_i32, %c0_i32_0 : i32, i32
  }
  func.func @transform_9(%arg0: i32) -> (i32, i32) {
    %c0_i32 = arith.constant 0 : i32
    %c0_i32_0 = arith.constant 0 : i32
    %c0_i32_1 = arith.constant 0 : i32
    return %c0_i32, %c0_i32_0 : i32, i32
  }
  func.func @transform_10(%arg0: i32) -> (i32, i32) {
    %c0_i32 = arith.constant 0 : i32
    %c0_i32_0 = arith.constant 0 : i32
    %c0_i32_1 = arith.constant 0 : i32
    return %c0_i32, %c0_i32_0 : i32, i32
  }
  func.func @transform_11(%arg0: i32) -> (i32, i32) {
    %c0_i32 = arith.constant 0 : i32
    %c0_i32_0 = arith.constant 0 : i32
    return %c0_i32, %arg0 : i32, i32
  }
}

</mosaic_0001>

<bundles_post_ra>
// kernel: inception_res_a_forward.1
= control target key start
LH: loop header
LB: loop body
LE: loop exit
PB: predicated region body
PF: predicated region fallthrough
CT: control target
= control target key end

     0   :  { %v1117_v3 = vmov 0   ;;  %vm75_vm0 = vcmask 130048   ;;  %s1119_s24 = smov 111   ;;  %s1120_s25 = smov 16   ;;  %v209_v41 = vlaneseq  ;;  %vm378_vm9 = vcmask 588800   ;;  %s2163_s0 = inlined_call_operand.vmem [shape: f32[16,512], index: 0, kind: input, shape index: {}]   ;;  %s2164_s2 = inlined_call_operand.vmem [shape: f32[24,16], index: 2, kind: input, shape index: {}]   ;;  %s2165_s3 = inlined_call_operand.vmem [shape: f32[24,1], index: 3, kind: input, shape index: {}]   ;;  %s2166_s1 = inlined_call_operand.vmem [shape: f32[9,512], index: 1, kind: input, shape index: {}]   ;;  %s2167_s7 = inlined_call_operand.vmem [shape: f32[8,1], index: 7, kind: input, shape index: {}]   ;;  %s2168_s4 = inlined_call_operand.vmem [shape: f32[8,72], index: 4, kind: input, shape index: {}]   ;;  %s2169_s6 = inlined_call_operand.vmem [shape: f32[8,72], index: 6, kind: input, shape index: {}]   ;;  %s2170_s9 = inlined_call_operand.vmem [shape: f32[16,1], index: 9, kind: input, shape index: {}]   ;;  %s2171_s5 = inlined_call_operand.vmem [shape: f32[8,1], index: 5, kind: input, shape index: {}]   ;;  %s2172_s8 = inlined_call_operand.vmem [shape: f32[16,72], index: 8, kind: input, shape index: {}]   ;;  %s2173_s10 = inlined_call_operand.vmem [shape: f32[16,32], index: 10, kind: input, shape index: {}]   ;;  %s2174_s11 = inlined_call_operand.vmem [shape: f32[16,512], index: 11, kind: output, shape index: {}]  }
   0x1   :  { %v42_v0 = vld [vmem:[%s2163_s0 + $0x20] sm:$0xff]  ;;  %v43_v1 = vld [vmem:[%s2163_s0 + $0x28] sm:$0xff]  ;;  %v44_v2 = vld [vmem:[%s2163_s0 + $0x30] sm:$0xff]  ;;  %1102 = vset.pattern.permute.xlu0 %v1117_v3  ;;  %1104 = vset.pattern.permute.xlu2 %v1117_v3  ;;  %s1121_s26 = smov 113   ;;  %s1122_s27 = smov 1   ;;  %vm938_vm10 = vcmask 261120  }
   0x2   :  { %99 = vmatpush.msra.mxu0 %v42_v0  ;;  %125 = vmatpush.msra.mxu1 %v43_v1  ;;  %v45_v4 = vld [vmem:[%s2163_s0 + $0x38] sm:$0xff]  ;;  %v38_v5 = vld [vmem:[%s2163_s0] sm:$0xff]  ;;  %v39_v6 = vld [vmem:[%s2163_s0 + $0x8] sm:$0xff]  ;;  %s1123_s28 = smov 15   ;;  %s1124_s29 = smov 127   ;;  %v1347_v44 = vand.u32 127, %v209_v41 }
   0x3   :  { %151 = vmatpush.msra.mxu2 %v44_v2  ;;  %177 = vmatpush.msra.mxu3 %v45_v4  ;;  %v40_v7 = vld [vmem:[%s2163_s0 + $0x10] sm:$0xff]  ;;  %v41_v8 = vld [vmem:[%s2163_s0 + $0x18] sm:$0xff]  ;;  %v54_v9 = vld [vmem:[%s2164_s2] sm:$0xff]  ;;  %s1125_s30 = smov 17  }
   0x4   :  { %100 = vmatpush.msra.mxu0 %v38_v5  ;;  %126 = vmatpush.msra.mxu1 %v39_v6  ;;  %v58_v10 = vld [vmem:[%s2165_s3 + $0x8] sm:$0xff]  ;;  %v59_v12 = vld [vmem:[%s2165_s3 + $0x10] sm:$0xff]  ;;  %v1358_v47 = vld [vmem:[%s2166_s1] sm:$0xff]  ;;  %vm337_vm1 = vcmp.lt.s32.totalorder %v1347_v44, 112  ;;  %vm358_vm2 = vcmp.lt.s32.totalorder %v1347_v44, 111  ;;  %vm295_vm3 = vcmp.lt.s32.totalorder %v1347_v44, 127 }
   0x5   :  { %152 = vmatpush.msra.mxu2 %v40_v7  ;;  %178 = vmatpush.msra.mxu3 %v41_v8  ;;  %v55_v11 = vld [vmem:[%s2164_s2 + $0x8] sm:$0xff]  ;;  %v56_v13 = vld [vmem:[%s2164_s2 + $0x10] sm:$0xff]  ;;  %s1118_s2 = smov 112   ;;  %v1367_v48 = vld [vmem:[%s2166_s1 + $0x20] ss:$0 sm:$0xff]  ;;  %v1374_v53 = vperm.slane %v1358_v47, 7 }
   0x6   :  { %1057 = vmatmul.msk.f32.vlgmr.msra.gmra.mxu0 %vm75_vm0, %v54_v9  ;;  %1060 = vmatmul.msk.f32.vlgmr.msra.gmra.mxu1 %vm75_vm0, %v54_v9  ;;  %vm316_vm4 = vcmp.lt.s32.totalorder %v1347_v44, 113  ;;  %v1408_v62 = vperm.slane %v1358_v47, 6  ;;  %v1413_v2 = vperm.slane %v1358_v47, 5  ;;  %vm274_vm5 = vcmp.lt.s32.totalorder %v1347_v44, 1 }
   0x7   :  { %1063 = vmatmul.msk.f32.vlgmr.msra.gmra.mxu2 %vm75_vm0, %v54_v9  ;;  %1066 = vmatmul.msk.f32.vlgmr.msra.gmra.mxu3 %vm75_vm0, %v54_v9  ;;  %vm253_vm6 = vcmp.lt.s32.totalorder %v1347_v44, 15  ;;  %vm232_vm7 = vcmp.lt.s32.totalorder %v1347_v44, 16  ;;  %vm211_vm8 = vcmp.lt.s32.totalorder %v1347_v44, 17 }
   0x8   :  { %67 = vperm.xlu0 %1102, %v58_v10   ;;  %1103 = vset.pattern.permute.xlu1 %v1117_v3  ;;  %v1443_v10 = vld [vmem:[%s2166_s1 + $0x38] ss:$0 sm:$0xff] }
   0xe   :  { %1058 = vmatmul.msk.f32.gmra.mxu0 %vm75_vm0, %v55_v11  ;;  %1061 = vmatmul.msk.f32.gmra.mxu1 %vm75_vm0, %v55_v11 }
   0xf   :  { %1064 = vmatmul.msk.f32.gmra.mxu2 %vm75_vm0, %v55_v11  ;;  %1067 = vmatmul.msk.f32.gmra.mxu3 %vm75_vm0, %v55_v11 }
  0x10   :  { %72 = vperm.xlu0 %1102, %v59_v12  }
  0x16   :  { %1059 = vmatmul.msk.f32.gmra.mxu0 %vm75_vm0, %v56_v13  ;;  %1062 = vmatmul.msk.f32.gmra.mxu1 %vm75_vm0, %v56_v13 }
  0x17   :  { %1065 = vmatmul.msk.f32.gmra.mxu2 %vm75_vm0, %v56_v13  ;;  %1068 = vmatmul.msk.f32.gmra.mxu3 %vm75_vm0, %v56_v13 }
  0x7a   :  { %v68_v16 = vpop.permute.xlu0 %67 }
  0x82   :  { %v73_v32 = vpop.permute.xlu0 %72 }
  0x83   :  { %v1237_v14 = vpop.f32.mrf.mxu0  ;;  %v1239_v15 = vpop.f32.mrf.mxu1 }
  0x8a   :  { %v1251_v23 = vpop.f32.mrf.mxu2  ;;  %v1273_v27 = vpop.f32.mrf.mxu3 }
  0x8b   :  { %v105_v17 = vpop.f32.mrf.mxu0  ;;  %v131_v18 = vpop.f32.mrf.mxu1 }
  0x8c   :  { %v106_v19 = vadd.f32 %v105_v17, %v68_v16  ;;  %v132_v20 = vadd.f32 %v131_v18, %v68_v16 }
  0x8e   :  { %v1241_v21 = vmax.f32 %v106_v19, 0.0  ;;  %v1243_v22 = vmax.f32 %v132_v20, 0.0 }
  0x90   :  { %331 = vrot.lane.b32.xlu0 %v1243_v22, %s1118_s2  ;;  %329 = vrot.lane.b32.xlu2 %v1241_v21, %s1118_s2 }
  0x91   :  { %350 = vrot.lane.b32.xlu1 %v1241_v21, %s1119_s24 }
  0x92   :  { %v157_v24 = vpop.f32.mrf.mxu2  ;;  %v183_v28 = vpop.f32.mrf.mxu3 }
  0x93   :  { %v158_v25 = vadd.f32 %v157_v24, %v68_v16  ;;  %v184_v29 = vadd.f32 %v183_v28, %v68_v16  ;;  %v108_v31 = vpop.f32.mrf.mxu0  ;;  %v134_v35 = vpop.f32.mrf.mxu1  ;;  %v1470_v24 = vperm.slane %v1358_v47, 3  ;;  %v1482_v28 = vld [vmem:[%s2166_s1 + $0x30] ss:$0 sm:$0xff] }
  0x94   :  { %v109_v33 = vadd.f32 %v108_v31, %v73_v32  ;;  %v135_v36 = vadd.f32 %v134_v35, %v73_v32 }
  0x95   :  { %v1265_v26 = vmax.f32 %v158_v25, 0.0  ;;  %v1287_v30 = vmax.f32 %v184_v29, 0.0  ;;  %v1477_v25 = vld [vmem:[%s2166_s1 + $0x28] ss:$0 sm:$0xff] }
  0x96   :  { %v1307_v34 = vmax.f32 %v109_v33, 0.0  ;;  %v1321_v37 = vmax.f32 %v135_v36, 0.0 }
  0x98   :  { %226 = vrot.lane.b32.xlu0 %v1243_v22, %s1120_s25  ;;  %308 = vrot.lane.b32.xlu2 %v1241_v21, %s1121_s26 }
  0x99   :  { %268 = vrot.lane.b32.xlu1 %v1243_v22, %s1122_s27 }
  0x9a   :  { %v186_v40 = vpop.f32.mrf.mxu3  ;;  %v160_v46 = vpop.f32.mrf.mxu2 }
  0x9b   :  { %v187_v42 = vadd.f32 %v186_v40, %v73_v32  ;;  %v161_v49 = vadd.f32 %v160_v46, %v73_v32  ;;  %v47_v32 = vld [vmem:[%s2166_s1 + $0x8] sm:$0xff] }
  0x9c   :  { %v1495_v36 = vperm.slane %v47_v32, 7 }
  0x9d   :  { %v1349_v45 = vmax.f32 %v187_v42, 0.0  ;;  %v1384_v57 = vmax.f32 %v161_v49, 0.0 }
  0xa0   :  { %245 = vrot.lane.b32.xlu0 %v1241_v21, %s1123_s28  ;;  %287 = vrot.lane.b32.xlu2 %v1241_v21, %s1124_s29 }
  0xa1   :  { %310 = vrot.lane.b32.xlu1 %v1243_v22, %s1121_s26 }
  0xa8   :  { %333 = vrot.lane.b32.xlu0 %v1265_v26, %s1118_s2  ;;  %352 = vrot.lane.b32.xlu2 %v1243_v22, %s1119_s24 }
  0xa9   :  { %203 = vrot.lane.b32.xlu1 %v1243_v22, %s1125_s30 }
  0xb0   :  { %312 = vrot.lane.b32.xlu0 %v1265_v26, %s1121_s26  ;;  %247 = vrot.lane.b32.xlu2 %v1243_v22, %s1123_s28 }
  0xb1   :  { %266 = vrot.lane.b32.xlu1 %v1241_v21, %s1122_s27 }
  0xb8   :  { %291 = vrot.lane.b32.xlu0 %v1265_v26, %s1124_s29  ;;  %289 = vrot.lane.b32.xlu2 %v1243_v22, %s1124_s29 }
  0xb9   :  { %201 = vrot.lane.b32.xlu1 %v1241_v21, %s1125_s30 }
  0xc0   :  { %272 = vrot.lane.b32.xlu0 %v1287_v30, %s1122_s27  ;;  %224 = vrot.lane.b32.xlu2 %v1241_v21, %s1120_s25 }
  0xc1   :  { %354 = vrot.lane.b32.xlu1 %v1265_v26, %s1119_s24 }
  0xc8   :  { %249 = vrot.lane.b32.xlu0 %v1265_v26, %s1123_s28  ;;  %356 = vrot.lane.b32.xlu2 %v1287_v30, %s1119_s24 }
  0xc9   :  { %335 = vrot.lane.b32.xlu1 %v1287_v30, %s1118_s2 }
  0xd0   :  { %207 = vrot.lane.b32.xlu0 %v1287_v30, %s1125_s30  ;;  %270 = vrot.lane.b32.xlu2 %v1265_v26, %s1122_s27 }
  0xd1   :  { %314 = vrot.lane.b32.xlu1 %v1287_v30, %s1121_s26 }
  0xd8   :  { %546 = vrot.lane.b32.xlu0 %v1307_v34, %s1121_s26  ;;  %230 = vrot.lane.b32.xlu2 %v1287_v30, %s1120_s25 }
  0xd9   :  { %293 = vrot.lane.b32.xlu1 %v1287_v30, %s1124_s29 }
  0xe0   :  { %530 = vrot.lane.b32.xlu0 %v1307_v34, %s1124_s29  ;;  %205 = vrot.lane.b32.xlu2 %v1265_v26, %s1125_s30 }
  0xe1   :  { %251 = vrot.lane.b32.xlu1 %v1287_v30, %s1123_s28 }
  0xe8   :  { %580 = vrot.lane.b32.xlu0 %v1321_v37, %s1119_s24  ;;  %562 = vrot.lane.b32.xlu2 %v1307_v34, %s1118_s2 }
  0xe9   :  { %228 = vrot.lane.b32.xlu1 %v1265_v26, %s1120_s25 }
  0xea   :  { %v1329_v38 = vpop.permute.xlu2 %329 }
  0xf0   :  { %500 = vrot.lane.b32.xlu0 %v1321_v37, %s1123_s28  ;;  %564 = vrot.lane.b32.xlu2 %v1321_v37, %s1118_s2 }
  0xf1   :  { %578 = vrot.lane.b32.xlu1 %v1307_v34, %s1119_s24 }
  0xf2   :  { %v1337_v39 = vpop.permute.xlu2 %308 }
  0xf8   :  { %532 = vrot.lane.b32.xlu0 %v1321_v37, %s1124_s29  ;;  %484 = vrot.lane.b32.xlu2 %v1321_v37, %s1120_s25 }
  0xf9   :  { %516 = vrot.lane.b32.xlu1 %v1321_v37, %s1122_s27 }
  0xfa   :  { %v1345_v43 = vpop.permute.xlu2 %287 }
 0x100   :  { %584 = vrot.lane.b32.xlu0 %v1349_v45, %s1119_s24  ;;  %468 = vrot.lane.b32.xlu2 %v1321_v37, %s1125_s30 }
 0x101   :  { %548 = vrot.lane.b32.xlu1 %v1321_v37, %s1121_s26 }
 0x102   :  { %v1369_v50 = vpop.permute.xlu0 %331  ;;  %v1371_v51 = vpop.permute.xlu2 %352 }
 0x103   :  { %v351_v52 = vpop.permute.xlu1 %350  ;;  %v340_v54 = vsel %vm337_vm1, %v1329_v38, %v1369_v50 }
 0x104   :  { %v361_v55 = vsel %vm358_vm2, %v351_v52, %v1371_v51  ;;  %v346_v58 = vmul.f32 %v1374_v53, %v340_v54  ;;  %v1509_v54 = vperm.slane %v47_v32, 6 }
 0x105   :  { %v367_v56 = vmul.f32 %v1367_v48, %v361_v55 }
 0x107   :  { %389 = vmatpush.msrb.mxu0 %v367_v56  ;;  %v1515_v56 = vperm.slane %v47_v32, 5 }
 0x108   :  { %566 = vrot.lane.b32.xlu0 %v1384_v57, %s1118_s2  ;;  %582 = vrot.lane.b32.xlu2 %v1384_v57, %s1119_s24 }
 0x109   :  { %568 = vrot.lane.b32.xlu1 %v1349_v45, %s1118_s2  ;;  %390 = vmatpush.msrb.mxu0 %v346_v58  ;;  %v1525_v58 = vld [vmem:[%s2166_s1 + $0x10] sm:$0xff] }
 0x10a   :  { %v1393_v59 = vpop.permute.xlu0 %226  ;;  %v1395_v60 = vpop.permute.xlu2 %247 }
 0x10b   :  { %v1397_v61 = vpop.permute.xlu1 %268 }
 0x110   :  { %520 = vrot.lane.b32.xlu0 %v1349_v45, %s1122_s27  ;;  %552 = vrot.lane.b32.xlu2 %v1349_v45, %s1121_s26 }
 0x111   :  { %550 = vrot.lane.b32.xlu1 %v1384_v57, %s1121_s26 }
 0x112   :  { %v1410_v63 = vpop.permute.xlu0 %245  ;;  %v290_v0 = vpop.permute.xlu2 %289 }
 0x113   :  { %v311_v1 = vpop.permute.xlu1 %310  ;;  %v298_v3 = vsel %vm295_vm3, %v1345_v43, %v290_v0 }
 0x114   :  { %v319_v4 = vsel %vm316_vm4, %v1337_v39, %v311_v1  ;;  %v304_v6 = vmul.f32 %v1413_v2, %v298_v3 }
 0x115   :  { %v325_v5 = vmul.f32 %v1408_v62, %v319_v4 }
 0x117   :  { %391 = vmatpush.msrb.mxu0 %v325_v5 }
 0x118   :  { %486 = vrot.lane.b32.xlu0 %v1384_v57, %s1120_s25  ;;  %536 = vrot.lane.b32.xlu2 %v1349_v45, %s1124_s29 }
 0x119   :  { %534 = vrot.lane.b32.xlu1 %v1384_v57, %s1124_s29  ;;  %392 = vmatpush.msrb.mxu0 %v304_v6 }
 0x11a   :  { %v1429_v7 = vpop.permute.xlu0 %333  ;;  %v1431_v8 = vpop.permute.xlu2 %224 }
 0x11b   :  { %393 = vmatpush.msrb.mxu0 %v1241_v21  ;;  %v1434_v9 = vpop.permute.xlu1 %203  ;;  %v595_v21 = vld [vmem:[%s2167_s7] sm:$0xff]  ;;  %v339_v40 = vsel %vm337_vm1, %v1369_v50, %v1429_v7 }
 0x11c   :  { %v347_v50 = vmul.f32 %v1495_v36, %v339_v40 }
 0x120   :  { %470 = vrot.lane.b32.xlu0 %v1384_v57, %s1125_s30  ;;  %518 = vrot.lane.b32.xlu2 %v1384_v57, %s1122_s27 }
 0x121   :  { %502 = vrot.lane.b32.xlu1 %v1384_v57, %s1123_s28 }
 0x122   :  { %v1447_v11 = vpop.permute.xlu0 %312  ;;  %v357_v12 = vpop.permute.xlu2 %356 }
 0x123   :  { %v362_v13 = vsel %vm358_vm2, %v357_v12, %v351_v52  ;;  %v267_v16 = vpop.permute.xlu1 %266  ;;  %v318_v55 = vsel %vm316_vm4, %v311_v1, %v1447_v11  ;;  %v1530_v1 = vld [vmem:[%s2166_s1 + $0x18] sm:$0xff] }
 0x124   :  { %v370_v17 = vmul.f32 %v1443_v10, %v362_v13  ;;  %v326_v3 = vmul.f32 %v1509_v54, %v318_v55  ;;  %v1539_v4 = vperm.slane %v1530_v1, 7  ;;  %v1580_v55 = vperm.slane %v1525_v58, 6 }
 0x126   :  { %449 = vmatpush.msrb.mxu3 %v370_v17  ;;  %v1547_v17 = vperm.slane %v47_v32, 3 }
 0x128   :  { %498 = vrot.lane.b32.xlu0 %v1307_v34, %s1123_s28  ;;  %504 = vrot.lane.b32.xlu2 %v1349_v45, %s1123_s28 }
 0x129   :  { %488 = vrot.lane.b32.xlu1 %v1349_v45, %s1120_s25 }
 0x12a   :  { %v1458_v18 = vpop.permute.xlu0 %291  ;;  %v1460_v19 = vpop.permute.xlu2 %270 }
 0x12b   :  { %v1462_v20 = vpop.permute.xlu1 %201 }
 0x130   :  { %598 = vperm.xlu0 %1102, %v595_v21   ;;  %514 = vrot.lane.b32.xlu2 %v1307_v34, %s1122_s27  ;;  %v277_v21 = vsel %vm274_vm5, %v267_v16, %v1397_v61 }
 0x131   :  { %472 = vrot.lane.b32.xlu1 %v1349_v45, %s1125_s30 }
 0x132   :  { %v1485_v29 = vpop.permute.xlu0 %272  ;;  %v1487_v31 = vpop.permute.xlu2 %230 }
 0x133   :  { %v278_v33 = vsel %vm274_vm5, %v1485_v29, %v267_v16  ;;  %v355_v35 = vpop.permute.xlu1 %354  ;;  %v256_v16 = vsel %vm253_vm6, %v1410_v63, %v1395_v60 }
 0x134   :  { %v359_v41 = vsel %vm358_vm2, %v355_v35, %v357_v12  ;;  %v360_v42 = vsel %vm358_vm2, %v1371_v51, %v355_v35  ;;  %v283_v46 = vmul.f32 %v1470_v24, %v278_v33  ;;  %v297_v51 = vsel %vm295_vm3, %v290_v0, %v1458_v18 }
 0x135   :  { %v368_v49 = vmul.f32 %v1477_v25, %v360_v42  ;;  %v369_v52 = vmul.f32 %v1482_v28, %v359_v41  ;;  %v1536_v0 = vperm.slane %v1525_v58, 7  ;;  %v305_v13 = vmul.f32 %v1515_v56, %v297_v51 }
 0x136   :  { %394 = vmatpush.msrb.mxu0 %v283_v46  ;;  %v1561_v42 = vperm.slane %v47_v32, 2  ;;  %v235_v46 = vsel %vm232_vm7, %v1431_v8, %v1393_v59 }
 0x137   :  { %409 = vmatpush.msrb.mxu1 %v368_v49  ;;  %429 = vmatpush.msrb.mxu2 %v369_v52  ;;  %v1577_v52 = vperm.slane %v47_v32, 0 }
 0x138   :  { %466 = vrot.lane.b32.xlu2 %v1307_v34, %s1125_s30  ;;  %v263_v49 = vmul.f32 %v1561_v42, %v256_v16  ;;  %v1607_v16 = vperm.slane %v1530_v1, 5 }
 0x139   :  { %482 = vrot.lane.b32.xlu1 %v1307_v34, %s1120_s25  ;;  %410 = vmatpush.msrb.mxu1 %v347_v50  ;;  %v214_v50 = vsel %vm211_vm8, %v1462_v20, %v1434_v9 }
 0x13a   :  { %v1541_v5 = vpop.permute.xlu0 %249  ;;  %v1543_v6 = vpop.permute.xlu2 %205 }
 0x13b   :  { %411 = vmatpush.msrb.mxu1 %v326_v3  ;;  %v336_v12 = vpop.permute.xlu1 %335 }
 0x13c   :  { %v338_v33 = vsel %vm337_vm1, %v1429_v7, %v336_v12  ;;  %v341_v35 = vsel %vm337_vm1, %v336_v12, %v1329_v38  ;;  %v284_v38 = vmul.f32 %v1547_v17, %v277_v21  ;;  %v1570_v7 = vperm.slane %v47_v32, 1 }
 0x13d   :  { %412 = vmatpush.msrb.mxu1 %v305_v13  ;;  %v348_v40 = vmul.f32 %v1536_v0, %v338_v33  ;;  %v349_v41 = vmul.f32 %v1539_v4, %v341_v35  ;;  %v221_v33 = vmul.f32 %v1577_v52, %v214_v50 }
 0x13e   :  { %v242_v32 = vmul.f32 %v1570_v7, %v235_v46 }
 0x13f   :  { %413 = vmatpush.msrb.mxu1 %v1243_v22  ;;  %430 = vmatpush.msrb.mxu2 %v348_v40  ;;  %v1583_v22 = vperm.slane %v1530_v1, 6 }
 0x140   :  { %450 = vmatpush.msrb.mxu3 %v349_v41  ;;  %v1604_v41 = vperm.slane %v1525_v58, 5 }
 0x141   :  { %414 = vmatpush.msrb.mxu1 %v284_v38 }
 0x142   :  { %v1589_v51 = vpop.permute.xlu0 %207  ;;  %v1591_v3 = vpop.permute.xlu2 %562 }
 0x143   :  { %415 = vmatpush.msrb.mxu1 %v263_v49  ;;  %v315_v12 = vpop.permute.xlu1 %314 }
 0x144   :  { %v317_v13 = vsel %vm316_vm4, %v1447_v11, %v315_v12  ;;  %v320_v21 = vsel %vm316_vm4, %v315_v12, %v1337_v39 }
 0x145   :  { %416 = vmatpush.msrb.mxu1 %v242_v32  ;;  %v327_v35 = vmul.f32 %v1580_v55, %v317_v13  ;;  %v328_v40 = vmul.f32 %v1583_v22, %v320_v21  ;;  %v1622_v32 = vperm.slane %v1525_v58, 3  ;;  %v1625_v13 = vperm.slane %v1530_v1, 3 }
 0x146   :  { %v276_v21 = vsel %vm274_vm5, %v1397_v61, %v1460_v19 }
 0x147   :  { %417 = vmatpush.msrb.mxu1 %v221_v33  ;;  %431 = vmatpush.msrb.mxu2 %v327_v35  ;;  %v255_v33 = vsel %vm253_vm6, %v1395_v60, %v1541_v5  ;;  %v285_v61 = vmul.f32 %v1622_v32, %v276_v21 }
 0x148   :  { %451 = vmatpush.msrb.mxu3 %v328_v40 }
 0x14a   :  { %v1609_v11 = vpop.permute.xlu0 %546  ;;  %v1611_v38 = vpop.permute.xlu2 %564 }
 0x14b   :  { %v294_v39 = vpop.permute.xlu1 %293 }
 0x14c   :  { %v296_v46 = vsel %vm295_vm3, %v1458_v18, %v294_v39  ;;  %v299_v49 = vsel %vm295_vm3, %v294_v39, %v1345_v43  ;;  %v275_v43 = vsel %vm274_vm5, %v1460_v19, %v1485_v29  ;;  %v1636_v18 = vperm.slane %v1525_v58, 2 }
 0x14d   :  { %v306_v50 = vmul.f32 %v1604_v41, %v296_v46  ;;  %v307_v12 = vmul.f32 %v1607_v16, %v299_v49  ;;  %v286_v35 = vmul.f32 %v1625_v13, %v275_v43  ;;  %v1647_v19 = vperm.slane %v1358_v47, 2 }
 0x14e   :  { %v1650_v29 = vperm.slane %v1530_v1, 2  ;;  %v236_v46 = vsel %vm232_vm7, %v1487_v31, %v1431_v8  ;;  %v1673_v43 = vperm.slane %v1358_v47, 0  ;;  %v215_v8 = vsel %vm211_vm8, %v1589_v51, %v1462_v20 }
 0x14f   :  { %432 = vmatpush.msrb.mxu2 %v306_v50  ;;  %452 = vmatpush.msrb.mxu3 %v307_v12  ;;  %v1690_v20 = vperm.slane %v1525_v58, 0 }
 0x151   :  { %433 = vmatpush.msrb.mxu2 %v1265_v26  ;;  %453 = vmatpush.msrb.mxu3 %v1287_v30  ;;  %v264_v26 = vmul.f32 %v1636_v18, %v255_v33  ;;  %v1658_v30 = vperm.slane %v1358_v47, 1  ;;  %v1682_v33 = vperm.slane %v1525_v58, 1 }
 0x152   :  { %v1652_v40 = vpop.permute.xlu0 %530  ;;  %v1654_v39 = vpop.permute.xlu2 %484 }
 0x153   :  { %434 = vmatpush.msrb.mxu2 %v285_v61  ;;  %454 = vmatpush.msrb.mxu3 %v286_v35  ;;  %v252_v60 = vpop.permute.xlu1 %251  ;;  %v1685_v61 = vperm.slane %v1530_v1, 1 }
 0x154   :  { %v254_v49 = vsel %vm253_vm6, %v1541_v5, %v252_v60  ;;  %v257_v50 = vsel %vm253_vm6, %v252_v60, %v1410_v63  ;;  %v241_v5 = vmul.f32 %v1658_v30, %v236_v46  ;;  %v220_v63 = vmul.f32 %v1673_v43, %v215_v8 }
 0x155   :  { %435 = vmatpush.msrb.mxu2 %v264_v26  ;;  %v262_v12 = vmul.f32 %v1647_v19, %v257_v50  ;;  %v265_v21 = vmul.f32 %v1650_v29, %v254_v49  ;;  %v1693_v26 = vperm.slane %v1530_v1, 0  ;;  %v213_v46 = vsel %vm211_vm8, %v1434_v9, %v1543_v6 }
 0x156   :  { %v212_v49 = vsel %vm211_vm8, %v1543_v6, %v1589_v51  ;;  %v222_v9 = vmul.f32 %v1690_v20, %v213_v46 }
 0x157   :  { %395 = vmatpush.msrb.mxu0 %v262_v12  ;;  %455 = vmatpush.msrb.mxu3 %v265_v21  ;;  %v223_v21 = vmul.f32 %v1693_v26, %v212_v49 }
 0x159   :  { %396 = vmatpush.msrb.mxu0 %v241_v5 }
 0x15a   :  { %v581_v47 = vpop.permute.xlu0 %580  ;;  %v1687_v35 = vpop.permute.xlu2 %468 }
 0x15b   :  { %397 = vmatpush.msrb.mxu0 %v220_v63  ;;  %v229_v60 = vpop.permute.xlu1 %228 }
 0x15c   :  { %v233_v50 = vsel %vm232_vm7, %v229_v60, %v1487_v31  ;;  %v234_v58 = vsel %vm232_vm7, %v1393_v59, %v229_v60  ;;  %v572_v59 = vsel %vm337_vm1, %v1591_v3, %v1611_v38 }
 0x15d   :  { %v243_v1 = vmul.f32 %v1682_v33, %v234_v58  ;;  %v244_v12 = vmul.f32 %v1685_v61, %v233_v50  ;;  %v574_v46 = vmul.f32 %v572_v59, %v1374_v53 }
 0x15f   :  { %436 = vmatpush.msrb.mxu2 %v243_v1  ;;  %456 = vmatpush.msrb.mxu3 %v244_v12 }
 0x161   :  { %437 = vmatpush.msrb.mxu2 %v222_v9  ;;  %457 = vmatpush.msrb.mxu3 %v223_v21 }
 0x162   :  { %v1713_v6 = vpop.permute.xlu0 %500  ;;  %v583_v51 = vpop.permute.xlu2 %582 }
 0x163   :  { %v587_v31 = vsel %vm358_vm2, %v581_v47, %v583_v51  ;;  %v579_v8 = vpop.permute.xlu1 %578 }
 0x164   :  { %v591_v5 = vmul.f32 %v1477_v25, %v587_v31  ;;  %v588_v63 = vsel %vm358_vm2, %v579_v8, %v581_v47 }
 0x165   :  { %v590_v60 = vmul.f32 %v1367_v48, %v588_v63 }
 0x166   :  { %631 = vmatpush.msra.mxu1 %v591_v5 }
 0x167   :  { %611 = vmatpush.msra.mxu0 %v590_v60 }
 0x169   :  { %612 = vmatpush.msra.mxu0 %v574_v46 }
 0x16a   :  { %v1726_v49 = vpop.permute.xlu0 %532  ;;  %v553_v50 = vpop.permute.xlu2 %552 }
 0x16b   :  { %v1728_v58 = vpop.permute.xlu1 %516  ;;  %v540_v31 = vsel %vm295_vm3, %v1652_v40, %v1726_v49 }
 0x16c   :  { %v542_v60 = vmul.f32 %v540_v31, %v1413_v2  ;;  %v557_v31 = vsel %vm316_vm4, %v553_v50, %v1609_v11 }
 0x172   :  { %v585_v1 = vpop.permute.xlu0 %584  ;;  %v537_v12 = vpop.permute.xlu2 %536 }
 0x173   :  { %v586_v9 = vsel %vm358_vm2, %v583_v51, %v585_v1  ;;  %v589_v47 = vsel %vm358_vm2, %v585_v1, %v579_v8  ;;  %v549_v21 = vpop.permute.xlu1 %548  ;;  %v371_v51 = vld [vmem:[%s2168_s4] sm:$0xff] }
 0x174   :  { %v592_v59 = vmul.f32 %v1482_v28, %v586_v9  ;;  %v593_v5 = vmul.f32 %v1443_v10, %v589_v47  ;;  %v556_v63 = vsel %vm316_vm4, %v1609_v11, %v549_v21  ;;  %1071 = vmatmul.msk.f32.vlgmr.msrb.gmra.mxu2 %vm378_vm9, %v371_v51  ;;  %1072 = vmatmul.msk.f32.vlgmr.msrb.gmra.mxu3 %vm378_vm9, %v371_v51 }
 0x175   :  { %v558_v8 = vmul.f32 %v556_v63, %v1408_v62  ;;  %1069 = vmatmul.msk.f32.vlgmr.msrb.gmra.mxu0 %vm378_vm9, %v371_v51  ;;  %1070 = vmatmul.msk.f32.vlgmr.msrb.gmra.mxu1 %vm378_vm9, %v371_v51  ;;  %v561_v11 = vmul.f32 %v557_v31, %v1583_v22 }
 0x176   :  { %651 = vmatpush.msra.mxu2 %v592_v59  ;;  %671 = vmatpush.msra.mxu3 %v593_v5 }
 0x177   :  { %613 = vmatpush.msra.mxu0 %v558_v8 }
 0x179   :  { %614 = vmatpush.msra.mxu0 %v542_v60 }
 0x17a   :  { %v567_v46 = vpop.permute.xlu0 %566  ;;  %v519_v1 = vpop.permute.xlu2 %518 }
 0x17b   :  { %v571_v9 = vsel %vm337_vm1, %v1611_v38, %v567_v46  ;;  %615 = vmatpush.msra.mxu0 %v1307_v34  ;;  %v569_v47 = vpop.permute.xlu1 %568  ;;  %v541_v34 = vsel %vm295_vm3, %v537_v12, %v1652_v40 }
 0x17c   :  { %v575_v59 = vmul.f32 %v571_v9, %v1495_v36  ;;  %v570_v5 = vsel %vm337_vm1, %v567_v46, %v569_v47  ;;  %v573_v63 = vsel %vm337_vm1, %v569_v47, %v1591_v3  ;;  %v545_v8 = vmul.f32 %v541_v34, %v1607_v16 }
 0x17d   :  { %v576_v51 = vmul.f32 %v570_v5, %v1536_v0  ;;  %v577_v38 = vmul.f32 %v573_v63, %v1539_v4 }
 0x17e   :  { %632 = vmatpush.msra.mxu1 %v575_v59 }
 0x17f   :  { %652 = vmatpush.msra.mxu2 %v576_v51  ;;  %672 = vmatpush.msra.mxu3 %v577_v38 }
 0x181   :  { %673 = vmatpush.msra.mxu3 %v561_v11 }
 0x182   :  { %v521_v60 = vpop.permute.xlu0 %520  ;;  %v505_v46 = vpop.permute.xlu2 %504 }
 0x183   :  { %v522_v3 = vsel %vm274_vm5, %v519_v1, %v521_v60  ;;  %674 = vmatpush.msra.mxu3 %v545_v8  ;;  %v551_v9 = vpop.permute.xlu1 %550  ;;  %v523_v8 = vsel %vm274_vm5, %v1728_v58, %v519_v1 }
 0x184   :  { %v529_v47 = vmul.f32 %v522_v3, %v1625_v13  ;;  %v554_v40 = vsel %vm316_vm4, %v551_v9, %v553_v50  ;;  %v555_v31 = vsel %vm316_vm4, %v549_v21, %v551_v9 }
 0x185   :  { %v559_v59 = vmul.f32 %v555_v31, %v1509_v54  ;;  %v560_v5 = vmul.f32 %v554_v40, %v1580_v55  ;;  %675 = vmatpush.msra.mxu3 %v1349_v45 }
 0x187   :  { %633 = vmatpush.msra.mxu1 %v559_v59  ;;  %653 = vmatpush.msra.mxu2 %v560_v5 }
 0x188   :  { %676 = vmatpush.msra.mxu3 %v529_v47 }
 0x18a   :  { %v487_v63 = vpop.permute.xlu0 %486  ;;  %v515_v51 = vpop.permute.xlu2 %514 }
 0x18b   :  { %v525_v38 = vsel %vm274_vm5, %v521_v60, %v515_v51  ;;  %v535_v34 = vpop.permute.xlu1 %534  ;;  %v524_v60 = vsel %vm274_vm5, %v515_v51, %v1728_v58  ;;  %v491_v47 = vsel %vm232_vm7, %v1654_v39, %v487_v63  ;;  %v594_v51 = vld [vmem:[%s2169_s6] sm:$0xff] }
 0x18c   :  { %v526_v50 = vmul.f32 %v525_v38, %v1470_v24  ;;  %v538_v21 = vsel %vm295_vm3, %v535_v34, %v537_v12  ;;  %v539_v11 = vsel %vm295_vm3, %v1726_v49, %v535_v34  ;;  %v528_v12 = vmul.f32 %v523_v8, %v1622_v32 }
 0x18d   :  { %v544_v45 = vmul.f32 %v538_v21, %v1604_v41  ;;  %v543_v3 = vmul.f32 %v539_v11, %v1515_v56  ;;  %v527_v49 = vmul.f32 %v524_v60, %v1547_v17  ;;  %v496_v59 = vmul.f32 %v491_v47, %v1682_v33 }
 0x18e   :  { %616 = vmatpush.msra.mxu0 %v526_v50 }
 0x18f   :  { %654 = vmatpush.msra.mxu2 %v544_v45  ;;  %634 = vmatpush.msra.mxu1 %v543_v3 }
 0x191   :  { %655 = vmatpush.msra.mxu2 %v1384_v57  ;;  %635 = vmatpush.msra.mxu1 %v1321_v37 }
 0x192   :  { %v471_v9 = vpop.permute.xlu0 %470 }
 0x193   :  { %656 = vmatpush.msra.mxu2 %v528_v12  ;;  %v503_v1 = vpop.permute.xlu1 %502  ;;  %636 = vmatpush.msra.mxu1 %v527_v49  ;;  %v475_v37 = vsel %vm211_vm8, %v1687_v35, %v471_v9  ;;  %v467_v12 = vpop.permute.xlu2 %466 }
 0x194   :  { %v506_v58 = vsel %vm253_vm6, %v503_v1, %v505_v46  ;;  %v507_v40 = vsel %vm253_vm6, %v1713_v6, %v503_v1  ;;  %v480_v5 = vmul.f32 %v475_v37, %v1690_v20 }
 0x195   :  { %v512_v57 = vmul.f32 %v507_v40, %v1636_v18  ;;  %v513_v31 = vmul.f32 %v506_v58, %v1650_v29 }
 0x197   :  { %657 = vmatpush.msra.mxu2 %v512_v57  ;;  %677 = vmatpush.msra.mxu3 %v513_v31 }
 0x199   :  { %658 = vmatpush.msra.mxu2 %v496_v59 }
 0x19a   :  { %v499_v38 = vpop.permute.xlu0 %498 }
 0x19b   :  { %v508_v34 = vsel %vm253_vm6, %v499_v38, %v1713_v6  ;;  %v509_v50 = vsel %vm253_vm6, %v505_v46, %v499_v38  ;;  %659 = vmatpush.msra.mxu2 %v480_v5  ;;  %v489_v21 = vpop.permute.xlu1 %488 }
 0x19c   :  { %v510_v11 = vmul.f32 %v509_v50, %v1647_v19  ;;  %v511_v45 = vmul.f32 %v508_v34, %v1561_v42  ;;  %v490_v8 = vsel %vm232_vm7, %v487_v63, %v489_v21  ;;  %1075 = vmatmul.msk.f32.vlgmr.msra.gmra.mxu2 %vm378_vm9, %v594_v51  ;;  %v476_v63 = vsel %vm211_vm8, %v467_v12, %v1687_v35 }
 0x19d   :  { %v497_v3 = vmul.f32 %v490_v8, %v1685_v61  ;;  %v479_v57 = vmul.f32 %v476_v63, %v1577_v52  ;;  %v372_v63 = vld [vmem:[%s2171_s5] sm:$0xff] }
 0x19e   :  { %617 = vmatpush.msra.mxu0 %v510_v11  ;;  %637 = vmatpush.msra.mxu1 %v511_v45 }
 0x19f   :  { %678 = vmatpush.msra.mxu3 %v497_v3 }
 0x1a2   :  { %v599_v59 = vpop.permute.xlu0 %598 }
 0x1a3   :  { %v473_v6 = vpop.permute.xlu1 %472 }
 0x1a4   :  { %v474_v46 = vsel %vm211_vm8, %v471_v9, %v473_v6  ;;  %v477_v1 = vsel %vm211_vm8, %v473_v6, %v467_v12  ;;  %v819_v12 = vld [vmem:[%s2170_s9 + $0x8] sm:$0xff] }
 0x1a5   :  { %v481_v60 = vmul.f32 %v474_v46, %v1693_v26  ;;  %v478_v31 = vmul.f32 %v477_v1, %v1673_v43 }
 0x1a7   :  { %679 = vmatpush.msra.mxu3 %v481_v60 }
 0x1a8   :  { %1076 = vmatmul.msk.f32.vlgmr.msra.gmra.mxu3 %vm378_vm9, %v594_v51 }
 0x1ab   :  { %v483_v49 = vpop.permute.xlu1 %482 }
 0x1ac   :  { %v492_v47 = vsel %vm232_vm7, %v483_v49, %v1654_v39  ;;  %v493_v9 = vsel %vm232_vm7, %v489_v21, %v483_v49  ;;  %v57_v49 = vld [vmem:[%s2165_s3] sm:$0xff] }
 0x1ad   :  { %v494_v58 = vmul.f32 %v493_v9, %v1658_v30  ;;  %v495_v40 = vmul.f32 %v492_v47, %v1570_v7 }
 0x1af   :  { %618 = vmatpush.msra.mxu0 %v494_v58  ;;  %638 = vmatpush.msra.mxu1 %v495_v40 }
 0x1b1   :  { %619 = vmatpush.msra.mxu0 %v478_v31  ;;  %639 = vmatpush.msra.mxu1 %v479_v57 }
 0x1b2   :  { %1073 = vmatmul.msk.f32.vlgmr.msra.gmra.mxu0 %vm378_vm9, %v594_v51  ;;  %1074 = vmatmul.msk.f32.vlgmr.msra.gmra.mxu1 %vm378_vm9, %v594_v51 }
 0x1f2   :  { %v1851_v39 = vpop.f32.mrf.mxu0  ;;  %v1853_v35 = vpop.f32.mrf.mxu1 }
 0x1f7   :  { %v1855_v37 = vpop.f32.mrf.mxu3  ;;  %v1857_v21 = vpop.f32.mrf.mxu2 }
 0x21f   :  { %v661_v6 = vpop.f32.mrf.mxu2 }
 0x220   :  { %v662_v46 = vadd.f32 %v661_v6, %v599_v59 }
 0x222   :  { %v1877_v60 = vmax.f32 %v662_v46, 0.0 }
 0x22b   :  { %v681_v8 = vpop.f32.mrf.mxu3 }
 0x22c   :  { %v682_v51 = vadd.f32 %v681_v8, %v599_v59 }
 0x22e   :  { %v1869_v3 = vmax.f32 %v682_v51, 0.0 }
 0x22f   :  { %v621_v5 = vpop.f32.mrf.mxu0  ;;  %v641_v38 = vpop.f32.mrf.mxu1 }
 0x230   :  { %v622_v34 = vadd.f32 %v621_v5, %v599_v59  ;;  %v642_v50 = vadd.f32 %v641_v38, %v599_v59 }
 0x232   :  { %v1859_v11 = vmax.f32 %v622_v34, 0.0  ;;  %v1861_v45 = vmax.f32 %v642_v50, 0.0 }
 0x234   :  { %800 = vrot.lane.b32.xlu1 %v1859_v11, %s1119_s24  ;;  %690 = vrot.lane.b32.xlu0 %v1861_v45, %s1125_s30 }
 0x235   :  { %706 = vrot.lane.b32.xlu2 %v1861_v45, %s1120_s25 }
 0x23c   :  { %784 = vrot.lane.b32.xlu1 %v1859_v11, %s1118_s2  ;;  %806 = vrot.lane.b32.xlu0 %v1869_v3, %s1119_s24 }
 0x23d   :  { %786 = vrot.lane.b32.xlu2 %v1861_v45, %s1118_s2 }
 0x244   :  { %768 = vrot.lane.b32.xlu1 %v1859_v11, %s1121_s26  ;;  %790 = vrot.lane.b32.xlu0 %v1869_v3, %s1118_s2 }
 0x245   :  { %804 = vrot.lane.b32.xlu2 %v1877_v60, %s1119_s24 }
 0x24c   :  { %752 = vrot.lane.b32.xlu1 %v1859_v11, %s1124_s29  ;;  %774 = vrot.lane.b32.xlu0 %v1869_v3, %s1121_s26 }
 0x24d   :  { %788 = vrot.lane.b32.xlu2 %v1877_v60, %s1118_s2 }
 0x254   :  { %758 = vrot.lane.b32.xlu0 %v1869_v3, %s1124_s29  ;;  %738 = vrot.lane.b32.xlu1 %v1861_v45, %s1122_s27 }
 0x255   :  { %772 = vrot.lane.b32.xlu2 %v1877_v60, %s1121_s26 }
 0x25c   :  { %742 = vrot.lane.b32.xlu0 %v1869_v3, %s1122_s27  ;;  %722 = vrot.lane.b32.xlu1 %v1861_v45, %s1123_s28 }
 0x25d   :  { %756 = vrot.lane.b32.xlu2 %v1877_v60, %s1124_s29 }
 0x264   :  { %726 = vrot.lane.b32.xlu0 %v1869_v3, %s1123_s28  ;;  %802 = vrot.lane.b32.xlu1 %v1861_v45, %s1119_s24 }
 0x265   :  { %740 = vrot.lane.b32.xlu2 %v1877_v60, %s1122_s27 }
 0x26c   :  { %708 = vrot.lane.b32.xlu0 %v1877_v60, %s1120_s25  ;;  %710 = vrot.lane.b32.xlu1 %v1869_v3, %s1120_s25 }
 0x26d   :  { %724 = vrot.lane.b32.xlu2 %v1877_v60, %s1123_s28 }
 0x274   :  { %770 = vrot.lane.b32.xlu0 %v1861_v45, %s1121_s26  ;;  %692 = vrot.lane.b32.xlu1 %v1877_v60, %s1125_s30 }
 0x275   :  { %694 = vrot.lane.b32.xlu2 %v1869_v3, %s1125_s30 }
 0x27c   :  { %720 = vrot.lane.b32.xlu0 %v1859_v11, %s1123_s28  ;;  %754 = vrot.lane.b32.xlu1 %v1861_v45, %s1124_s29 }
 0x27d   :  { %736 = vrot.lane.b32.xlu2 %v1859_v11, %s1122_s27 }
 0x284   :  { %827 = vperm.xlu0 %1102, %v819_v12   ;;  %704 = vrot.lane.b32.xlu1 %v1859_v11, %s1120_s25 }
 0x285   :  { %688 = vrot.lane.b32.xlu2 %v1859_v11, %s1125_s30 }
 0x28c   :  { %62 = vperm.xlu0 %1102, %v57_v49  }
 0x28d   :  { %375 = vperm.xlu2 %1104, %v372_v63  }
 0x28f   :  { %v1940_v1 = vpop.permute.xlu2 %706 }
 0x297   :  { %v787_v47 = vpop.permute.xlu2 %786 }
 0x29f   :  { %v805_v9 = vpop.permute.xlu2 %804 }
 0x2a6   :  { %v801_v58 = vpop.permute.xlu1 %800  ;;  %v1942_v40 = vpop.permute.xlu0 %690 }
 0x2a7   :  { %v789_v57 = vpop.permute.xlu2 %788 }
 0x2ae   :  { %v785_v31 = vpop.permute.xlu1 %784  ;;  %v807_v59 = vpop.permute.xlu0 %806 }
 0x2af   :  { %v808_v5 = vsel %vm358_vm2, %v805_v9, %v807_v59  ;;  %v811_v38 = vsel %vm358_vm2, %v807_v59, %v801_v58  ;;  %v1948_v34 = vpop.permute.xlu2 %772 }
 0x2b0   :  { %v814_v50 = vmul.f32 %v1482_v28, %v808_v5  ;;  %v815_v8 = vmul.f32 %v1443_v10, %v811_v38 }
 0x2b2   :  { %889 = vmatpush.msrb.mxu2 %v814_v50  ;;  %912 = vmatpush.msrb.mxu3 %v815_v8 }
 0x2b6   :  { %v1952_v51 = vpop.permute.xlu1 %768  ;;  %v791_v6 = vpop.permute.xlu0 %790 }
 0x2b7   :  { %v792_v46 = vsel %vm337_vm1, %v789_v57, %v791_v6  ;;  %v795_v12 = vsel %vm337_vm1, %v791_v6, %v785_v31  ;;  %v1960_v59 = vpop.permute.xlu2 %756 }
 0x2b8   :  { %v798_v49 = vmul.f32 %v792_v46, %v1536_v0  ;;  %v799_v63 = vmul.f32 %v795_v12, %v1539_v4 }
 0x2ba   :  { %890 = vmatpush.msrb.mxu2 %v798_v49  ;;  %913 = vmatpush.msrb.mxu3 %v799_v63 }
 0x2be   :  { %v1962_v10 = vpop.permute.xlu1 %752  ;;  %v775_v28 = vpop.permute.xlu0 %774 }
 0x2bf   :  { %v776_v5 = vsel %vm316_vm4, %v1948_v34, %v775_v28  ;;  %v779_v38 = vsel %vm316_vm4, %v775_v28, %v1952_v51  ;;  %v741_v4 = vpop.permute.xlu2 %740 }
 0x2c0   :  { %v782_v50 = vmul.f32 %v776_v5, %v1580_v55  ;;  %v783_v0 = vmul.f32 %v779_v38, %v1583_v22 }
 0x2c2   :  { %891 = vmatpush.msrb.mxu2 %v782_v50  ;;  %914 = vmatpush.msrb.mxu3 %v783_v0  ;;  %v794_v0 = vsel %vm337_vm1, %v785_v31, %v787_v47 }
 0x2c3   :  { %v796_v31 = vmul.f32 %v794_v0, %v1374_v53  ;;  %v818_v53 = vld [vmem:[%s2170_s9] sm:$0xff] }
 0x2c4   :  { %822 = vperm.xlu1 %1103, %v818_v53  }
 0x2c6   :  { %v759_v8 = vpop.permute.xlu0 %758  ;;  %v1972_v6 = vpop.permute.xlu1 %738 }
 0x2c7   :  { %v760_v46 = vsel %vm295_vm3, %v1960_v59, %v759_v8  ;;  %v763_v12 = vsel %vm295_vm3, %v759_v8, %v1962_v10  ;;  %v745_v22 = vsel %vm274_vm5, %v1972_v6, %v741_v4  ;;  %v725_v28 = vpop.permute.xlu2 %724 }
 0x2c8   :  { %v766_v49 = vmul.f32 %v760_v46, %v1604_v41  ;;  %v767_v55 = vmul.f32 %v763_v12, %v1607_v16  ;;  %v750_v63 = vmul.f32 %v745_v22, %v1622_v32 }
 0x2ca   :  { %892 = vmatpush.msrb.mxu2 %v766_v49  ;;  %915 = vmatpush.msrb.mxu3 %v767_v55 }
 0x2cc   :  { %893 = vmatpush.msrb.mxu2 %v1877_v60  ;;  %916 = vmatpush.msrb.mxu3 %v1869_v3 }
 0x2ce   :  { %v1988_v5 = vpop.permute.xlu0 %742  ;;  %894 = vmatpush.msrb.mxu2 %v750_v63  ;;  %v1990_v38 = vpop.permute.xlu1 %722 }
 0x2cf   :  { %v744_v41 = vsel %vm274_vm5, %v741_v4, %v1988_v5  ;;  %v729_v16 = vsel %vm253_vm6, %v1990_v38, %v725_v28 }
 0x2d0   :  { %v751_v32 = vmul.f32 %v744_v41, %v1625_v13  ;;  %v734_v60 = vmul.f32 %v729_v16, %v1636_v18  ;;  %v793_v13 = vsel %vm337_vm1, %v787_v47, %v789_v57 }
 0x2d1   :  { %v797_v55 = vmul.f32 %v793_v13, %v1495_v36 }
 0x2d2   :  { %895 = vmatpush.msrb.mxu2 %v734_v60  ;;  %917 = vmatpush.msrb.mxu3 %v751_v32 }
 0x2d6   :  { %v727_v3 = vpop.permute.xlu0 %726  ;;  %v803_v50 = vpop.permute.xlu1 %802 }
 0x2d7   :  { %v728_v8 = vsel %vm253_vm6, %v725_v28, %v727_v3  ;;  %v809_v4 = vsel %vm358_vm2, %v803_v50, %v805_v9  ;;  %v810_v46 = vsel %vm358_vm2, %v801_v58, %v803_v50 }
 0x2d8   :  { %v735_v18 = vmul.f32 %v728_v8, %v1650_v29  ;;  %v812_v12 = vmul.f32 %v1367_v48, %v810_v46  ;;  %v813_v49 = vmul.f32 %v1477_v25, %v809_v4  ;;  %v695_v29 = vpop.permute.xlu2 %694  ;;  %v817_v8 = vld [vmem:[%s2172_s8 + $0x8] sm:$0xff] }
 0x2da   :  { %843 = vmatpush.msrb.mxu0 %v812_v12  ;;  %918 = vmatpush.msrb.mxu3 %v735_v18 }
 0x2db   :  { %866 = vmatpush.msrb.mxu1 %v813_v49 }
 0x2dc   :  { %844 = vmatpush.msrb.mxu0 %v796_v31 }
 0x2dd   :  { %867 = vmatpush.msrb.mxu1 %v797_v55 }
 0x2de   :  { %v709_v9 = vpop.permute.xlu0 %708  ;;  %v711_v58 = vpop.permute.xlu1 %710 }
 0x2df   :  { %v713_v47 = vsel %vm232_vm7, %v1940_v1, %v709_v9  ;;  %v712_v48 = vsel %vm232_vm7, %v709_v9, %v711_v58 }
 0x2e0   :  { %v718_v25 = vmul.f32 %v713_v47, %v1682_v33  ;;  %v719_v36 = vmul.f32 %v712_v48, %v1685_v61 }
 0x2e2   :  { %896 = vmatpush.msrb.mxu2 %v718_v25  ;;  %919 = vmatpush.msrb.mxu3 %v719_v36 }
 0x2e6   :  { %v771_v57 = vpop.permute.xlu0 %770  ;;  %v693_v22 = vpop.permute.xlu1 %692 }
 0x2e7   :  { %v777_v63 = vsel %vm316_vm4, %v771_v57, %v1948_v34  ;;  %v778_v28 = vsel %vm316_vm4, %v1952_v51, %v771_v57  ;;  %v696_v41 = vsel %vm211_vm8, %v693_v22, %v695_v29  ;;  %v697_v33 = vsel %vm211_vm8, %v1942_v40, %v693_v22  ;;  %v816_v34 = vld [vmem:[%s2172_s8] sm:$0xff]  ;;  %v737_v51 = vpop.permute.xlu2 %736 }
 0x2e8   :  { %v780_v61 = vmul.f32 %v778_v28, %v1408_v62  ;;  %v781_v16 = vmul.f32 %v777_v63, %v1509_v54  ;;  %v702_v32 = vmul.f32 %v697_v33, %v1690_v20  ;;  %v703_v60 = vmul.f32 %v696_v41, %v1693_v26  ;;  %v936_v33 = vld [vmem:[%s2173_s10] sm:$0xff] }
 0x2e9   :  { %v746_v4 = vsel %vm274_vm5, %v737_v51, %v1972_v6 }
 0x2ea   :  { %845 = vmatpush.msrb.mxu0 %v780_v61  ;;  %868 = vmatpush.msrb.mxu1 %v781_v16  ;;  %v749_v6 = vmul.f32 %v746_v4, %v1547_v17 }
 0x2eb   :  { %897 = vmatpush.msrb.mxu2 %v702_v32  ;;  %920 = vmatpush.msrb.mxu3 %v703_v60 }
 0x2ec   :  { %1081 = vmatmul.msk.f32.vlgmr.msrb.gmra.mxu2 %vm378_vm9, %v816_v34  ;;  %1083 = vmatmul.msk.f32.vlgmr.msrb.gmra.mxu3 %vm378_vm9, %v816_v34 }
 0x2ee   :  { %v755_v62 = vpop.permute.xlu1 %754  ;;  %v721_v26 = vpop.permute.xlu0 %720 }
 0x2ef   :  { %v761_v54 = vsel %vm295_vm3, %v755_v62, %v1960_v59  ;;  %v762_v20 = vsel %vm295_vm3, %v1962_v10, %v755_v62  ;;  %v747_v59 = vsel %vm274_vm5, %v1988_v5, %v737_v51  ;;  %v731_v10 = vsel %vm253_vm6, %v727_v3, %v721_v26  ;;  %v689_v46 = vpop.permute.xlu2 %688 }
 0x2f0   :  { %v764_v50 = vmul.f32 %v762_v20, %v1413_v2  ;;  %v765_v0 = vmul.f32 %v761_v54, %v1515_v56  ;;  %v730_v2 = vsel %vm253_vm6, %v721_v26, %v1990_v38  ;;  %v748_v56 = vmul.f32 %v747_v59, %v1470_v24 }
 0x2f1   :  { %v732_v5 = vmul.f32 %v731_v10, %v1647_v19  ;;  %v733_v13 = vmul.f32 %v730_v2, %v1561_v42  ;;  %v698_v17 = vsel %vm211_vm8, %v689_v46, %v1942_v40  ;;  %v1109_v10 = vld [vmem:[%s2163_s0 + $0x10] sm:$0xff] }
 0x2f2   :  { %846 = vmatpush.msrb.mxu0 %v764_v50  ;;  %869 = vmatpush.msrb.mxu1 %v765_v0 }
 0x2f4   :  { %1082 = vmatmul.msk.f32.gmra.mxu2 %vm378_vm9, %v817_v8  ;;  %1084 = vmatmul.msk.f32.gmra.mxu3 %vm378_vm9, %v817_v8 }
 0x2f5   :  { %847 = vmatpush.msrb.mxu0 %v1859_v11  ;;  %870 = vmatpush.msrb.mxu1 %v1861_v45  ;;  %v699_v11 = vsel %vm211_vm8, %v695_v29, %v689_v46 }
 0x2f6   :  { %v705_v3 = vpop.permute.xlu1 %704  ;;  %v700_v45 = vmul.f32 %v699_v11, %v1673_v43  ;;  %v828_v44 = vpop.permute.xlu0 %827 }
 0x2f7   :  { %848 = vmatpush.msrb.mxu0 %v748_v56  ;;  %871 = vmatpush.msrb.mxu1 %v749_v6  ;;  %v714_v38 = vsel %vm232_vm7, %v705_v3, %v1940_v1  ;;  %v715_v24 = vsel %vm232_vm7, %v711_v58, %v705_v3  ;;  %v701_v1 = vmul.f32 %v698_v17, %v1577_v52  ;;  %v376_v18 = vpop.permute.xlu2 %375  ;;  %v1110_v56 = vld [vmem:[%s2163_s0 + $0x18] sm:$0xff]  ;;  %v1112_v17 = vld [vmem:[%s2163_s0 + $0x8] sm:$0xff] }
 0x2f8   :  { %v716_v19 = vmul.f32 %v715_v24, %v1658_v30  ;;  %v717_v42 = vmul.f32 %v714_v38, %v1570_v7  ;;  %v440_v58 = vadd.f32 %v1857_v21, %v376_v18  ;;  %v460_v47 = vadd.f32 %v1855_v37, %v376_v18  ;;  %v1111_v38 = vld [vmem:[%s2163_s0] sm:$0xff] }
 0x2f9   :  { %849 = vmatpush.msrb.mxu0 %v732_v5  ;;  %872 = vmatpush.msrb.mxu1 %v733_v13  ;;  %v420_v51 = vadd.f32 %v1853_v35, %v376_v18 }
 0x2fa   :  { %v464_v28 = vmax.f32 %v440_v58, 0.0  ;;  %v465_v41 = vmax.f32 %v460_v47, 0.0 }
 0x2fb   :  { %850 = vmatpush.msrb.mxu0 %v716_v19  ;;  %873 = vmatpush.msrb.mxu1 %v717_v42 }
 0x2fd   :  { %851 = vmatpush.msrb.mxu0 %v700_v45  ;;  %874 = vmatpush.msrb.mxu1 %v701_v1 }
 0x2fe   :  { %1077 = vmatmul.msk.f32.vlgmr.msrb.gmra.mxu0 %vm378_vm9, %v816_v34  ;;  %1079 = vmatmul.msk.f32.vlgmr.msrb.gmra.mxu1 %vm378_vm9, %v816_v34  ;;  %v63_v9 = vpop.permute.xlu0 %62  ;;  %v400_v34 = vadd.f32 %v1851_v39, %v376_v18  ;;  %v463_v39 = vmax.f32 %v420_v51, 0.0 }
 0x2ff   :  { %v155_v29 = vadd.f32 %v1251_v23, %v63_v9  ;;  %v181_v57 = vadd.f32 %v1273_v27, %v63_v9  ;;  %v103_v20 = vadd.f32 %v1237_v14, %v63_v9  ;;  %v129_v26 = vadd.f32 %v1239_v15, %v63_v9 }
 0x300   :  { %v462_v4 = vmax.f32 %v400_v34, 0.0 }
 0x301   :  { %v191_v21 = vmax.f32 %v155_v29, 0.0  ;;  %v192_v37 = vmax.f32 %v181_v57, 0.0  ;;  %v189_v14 = vmax.f32 %v103_v20, 0.0  ;;  %v190_v15 = vmax.f32 %v129_v26, 0.0 }
 0x306   :  { %1078 = vmatmul.msk.f32.gmra.mxu0 %vm378_vm9, %v817_v8  ;;  %1080 = vmatmul.msk.f32.gmra.mxu1 %vm378_vm9, %v817_v8  ;;  %v937_v8 = vld [vmem:[%s2173_s10 + $0x8] sm:$0xff] }
 0x336   :  { %v823_v40 = vpop.permute.xlu1 %822 }
 0x36f   :  { %v899_v7 = vpop.f32.mrf.mxu2  ;;  %v922_v30 = vpop.f32.mrf.mxu3 }
 0x370   :  { %v900_v52 = vadd.f32 %v899_v7, %v823_v40  ;;  %v923_v49 = vadd.f32 %v922_v30, %v823_v40  ;;  %v1114_v30 = vld [vmem:[%s2163_s0 + $0x38] sm:$0xff] }
 0x372   :  { %v930_v22 = vmax.f32 %v900_v52, 0.0  ;;  %v931_v63 = vmax.f32 %v923_v49, 0.0  ;;  %v1115_v49 = vld [vmem:[%s2163_s0 + $0x20] sm:$0xff] }
 0x377   :  { %v902_v43 = vpop.f32.mrf.mxu2  ;;  %v925_v12 = vpop.f32.mrf.mxu3 }
 0x378   :  { %v903_v31 = vadd.f32 %v902_v43, %v828_v44  ;;  %v926_v55 = vadd.f32 %v925_v12, %v828_v44 }
 0x37a   :  { %v934_v48 = vmax.f32 %v903_v31, 0.0  ;;  %v935_v53 = vmax.f32 %v926_v55, 0.0  ;;  %v1116_v55 = vld [vmem:[%s2163_s0 + $0x28] sm:$0xff] }
 0x37b   :  { %v853_v25 = vpop.f32.mrf.mxu0  ;;  %v876_v36 = vpop.f32.mrf.mxu1 }
 0x37c   :  { %1003 = vmatpush.msra.mxu2 %v934_v48  ;;  %1026 = vmatpush.msra.mxu3 %v935_v53  ;;  %v854_v61 = vadd.f32 %v853_v25, %v823_v40  ;;  %v877_v16 = vadd.f32 %v876_v36, %v823_v40 }
 0x37e   :  { %1004 = vmatpush.msra.mxu2 %v930_v22  ;;  %1027 = vmatpush.msra.mxu3 %v931_v63  ;;  %v928_v50 = vmax.f32 %v854_v61, 0.0  ;;  %v929_v0 = vmax.f32 %v877_v16, 0.0 }
 0x380   :  { %1005 = vmatpush.msra.mxu2 %v464_v28  ;;  %1028 = vmatpush.msra.mxu3 %v465_v41 }
 0x382   :  { %1006 = vmatpush.msra.mxu2 %v191_v21  ;;  %1029 = vmatpush.msra.mxu3 %v192_v37 }
 0x383   :  { %v856_v23 = vpop.f32.mrf.mxu0  ;;  %v879_v27 = vpop.f32.mrf.mxu1  ;;  %1089 = vmatmul.msk.f32.vlgmr.msra.gmra.mxu2 %vm938_vm10, %v936_v33  ;;  %1091 = vmatmul.msk.f32.vlgmr.msra.gmra.mxu3 %vm938_vm10, %v936_v33 }
 0x384   :  { %v857_v32 = vadd.f32 %v856_v23, %v828_v44  ;;  %v880_v60 = vadd.f32 %v879_v27, %v828_v44  ;;  %v1113_v44 = vld [vmem:[%s2163_s0 + $0x30] sm:$0xff] }
 0x386   :  { %v932_v62 = vmax.f32 %v857_v32, 0.0  ;;  %v933_v54 = vmax.f32 %v880_v60, 0.0 }
 0x388   :  { %957 = vmatpush.msra.mxu0 %v932_v62  ;;  %980 = vmatpush.msra.mxu1 %v933_v54 }
 0x38a   :  { %958 = vmatpush.msra.mxu0 %v928_v50  ;;  %981 = vmatpush.msra.mxu1 %v929_v0 }
 0x38b   :  { %1090 = vmatmul.msk.f32.gmra.mxu2 %vm938_vm10, %v937_v8  ;;  %1092 = vmatmul.msk.f32.gmra.mxu3 %vm938_vm10, %v937_v8 }
 0x38c   :  { %959 = vmatpush.msra.mxu0 %v462_v4  ;;  %982 = vmatpush.msra.mxu1 %v463_v39 }
 0x38e   :  { %960 = vmatpush.msra.mxu0 %v189_v14  ;;  %983 = vmatpush.msra.mxu1 %v190_v15 }
 0x38f   :  { %1085 = vmatmul.msk.f32.vlgmr.msra.gmra.mxu0 %vm938_vm10, %v936_v33  ;;  %1087 = vmatmul.msk.f32.vlgmr.msra.gmra.mxu1 %vm938_vm10, %v936_v33 }
 0x397   :  { %1086 = vmatmul.msk.f32.gmra.mxu0 %vm938_vm10, %v937_v8  ;;  %1088 = vmatmul.msk.f32.gmra.mxu1 %vm938_vm10, %v937_v8 }
 0x406   :  { %v1008_v35 = vpop.f32.mrf.mxu2  ;;  %v1031_v59 = vpop.f32.mrf.mxu3 }
 0x407   :  { %v1009_v2 = vadd.f32 %v1109_v10, %v1008_v35  ;;  %v1032_v6 = vadd.f32 %v1110_v56, %v1031_v59 }
 0x409   :  { %v1039_v46 = vmax.f32 %v1009_v2, 0.0  ;;  %v1040_v5 = vmax.f32 %v1032_v6, 0.0 }
 0x40b   :  { %1047 = vst [vmem:[%s2174_s11 + $0x10] sm:$0xff] %v1039_v46 }
 0x40c   :  { %v962_v3 = vpop.f32.mrf.mxu0  ;;  %v985_v13 = vpop.f32.mrf.mxu1  ;;  %1048 = vst [vmem:[%s2174_s11 + $0x18] sm:$0xff] %v1040_v5 }
 0x40d   :  { %v963_v24 = vadd.f32 %v1111_v38, %v962_v3  ;;  %v986_v11 = vadd.f32 %v1112_v17, %v985_v13 }
 0x40e   :  { %v1011_v19 = vpop.f32.mrf.mxu2  ;;  %v1034_v42 = vpop.f32.mrf.mxu3 }
 0x40f   :  { %v1037_v45 = vmax.f32 %v963_v24, 0.0  ;;  %v1038_v1 = vmax.f32 %v986_v11, 0.0  ;;  %v1012_v7 = vadd.f32 %v1113_v44, %v1011_v19  ;;  %v1035_v40 = vadd.f32 %v1114_v30, %v1034_v42 }
 0x411   :  { %1045 = vst [vmem:[%s2174_s11] sm:$0xff] %v1037_v45  ;;  %v1043_v18 = vmax.f32 %v1012_v7, 0.0  ;;  %v1044_v43 = vmax.f32 %v1035_v40, 0.0 }
 0x412   :  { %1046 = vst [vmem:[%s2174_s11 + $0x8] sm:$0xff] %v1038_v1 }
 0x413   :  { %1051 = vst [vmem:[%s2174_s11 + $0x30] sm:$0xff] %v1043_v18 }
 0x414   :  { %v965_v12 = vpop.f32.mrf.mxu0  ;;  %v988_v52 = vpop.f32.mrf.mxu1  ;;  %1052 = vst [vmem:[%s2174_s11 + $0x38] sm:$0xff] %v1044_v43 }
 0x415   :  { %v966_v31 = vadd.f32 %v1115_v49, %v965_v12  ;;  %v989_v9 = vadd.f32 %v1116_v55, %v988_v52 }
 0x417   :  { %v1041_v58 = vmax.f32 %v966_v31, 0.0  ;;  %v1042_v47 = vmax.f32 %v989_v9, 0.0 }
 0x419   :  { %1049 = vst [vmem:[%s2174_s11 + $0x20] sm:$0xff] %v1041_v58 }
 0x41a   :  { %1050 = vst [vmem:[%s2174_s11 + $0x28] sm:$0xff] %v1042_v47 }

</bundles_post_ra>
